<compile_context>
chip_gen: v7x
topology: tpu7x:2x2x1
jax: 0.10.0
libtpu: 0.0.40
codegen_flags: <defaults>
</compile_context>

<pallas_src>
import jax
import jax.numpy as jnp
from jax.experimental import pallas as pl
from jax.experimental.pallas import tpu as pltpu


# ---------------------------------------------------------------------------
# Kernel
# ---------------------------------------------------------------------------
def _mlp_kernel(x_ref, w1_ref, b1_ref, w2_ref, w3_ref, beta_out_ref, o_ref):
    # fc1 (+ folded InputNorm affine) + ReLU   (bf16 MXU inputs, f32 acc)
    h1 = jnp.dot(x_ref[...], w1_ref[...], preferred_element_type=jnp.float32)
    h1 = jnp.maximum(h1 + b1_ref[...], 0.0)

    # fc2 + ReLU   (sigma1 already folded into W2)
    h2 = jnp.dot(h1.astype(jnp.bfloat16), w2_ref[...],
                 preferred_element_type=jnp.float32)
    h2 = jnp.maximum(h2, 0.0)

    # fc3          (sigma2 * sigma3 * gamma_out already folded into W3)
    h3 = jnp.dot(h2.astype(jnp.bfloat16), w3_ref[...],
                 preferred_element_type=jnp.float32)

    # OutputNorm1 bias add (gamma_out folded into W3 above).
    o_ref[...] = h3 + beta_out_ref[...]


# ---------------------------------------------------------------------------
# Parameter preparation (done ONCE, not per forward call)
# ---------------------------------------------------------------------------
def _pad_to(a, shape):
    pads = [(0, t - s) for s, t in zip(a.shape, shape)]
    return jnp.pad(a, pads)


def _round_up(n, m):
    return ((n + m - 1) // m) * m


def prepare_params(params):
    """Fold scalars/affine into weights, cast to bf16, pad dims to 128."""
    D = 28 * 28
    hidden1 = params["w1"].shape[1]            # 600
    hidden2 = params["w2"].shape[1]            # 100
    num_classes = params["w3"].shape[1]
    h1p = _round_up(hidden1, 128)              # 640
    h2p = _round_up(hidden2, 128)              # 128
    ncp = _round_up(num_classes, 128)          # 128

    gamma_in = params["gamma_in"].reshape(()).astype(jnp.float32)
    gamma_out = params["gamma_out"].reshape(()).astype(jnp.float32)
    sigma1 = params["sigma1"].reshape(()).astype(jnp.float32)
    sigma2 = params["sigma2"].reshape(()).astype(jnp.float32)
    sigma3 = params["sigma3"].reshape(()).astype(jnp.float32)

    w1_f32 = params["w1"].astype(jnp.float32)                        # (784, 600)
    beta_in_flat = params["beta_in"].reshape(1, D).astype(jnp.float32)

    # Fold InputNorm into fc1:
    #   (gamma_in*x + beta_in) @ W1 == x @ (gamma_in*W1) + (beta_in @ W1)
    w1 = _pad_to(gamma_in * w1_f32, (D, h1p)).astype(jnp.bfloat16)   # (784, 640)
    bias1 = _pad_to(beta_in_flat @ w1_f32, (1, h1p)).astype(jnp.float32)  # (1, 640)

    # sigma1 folded into W2; sigma2*sigma3*gamma_out folded into W3.
    w2 = _pad_to(sigma1 * params["w2"].astype(jnp.float32),
                 (h1p, h2p)).astype(jnp.bfloat16)                    # (640, 128)
    w3 = _pad_to(sigma2 * sigma3 * gamma_out * params["w3"].astype(jnp.float32),
                 (h2p, ncp)).astype(jnp.bfloat16)                    # (128, 128)

    beta_out = _pad_to(params["beta_out"].reshape(1, num_classes),
                       (1, ncp)).astype(jnp.float32)                 # (1, 128)

    return {
        "w1": w1, "bias1": bias1, "w2": w2, "w3": w3,
        "beta_out": beta_out, "num_classes": num_classes,
    }


# ---------------------------------------------------------------------------
# Forward wrapper
# ---------------------------------------------------------------------------
def _choose_batch_tile(B, batch_tile):
    if B > batch_tile:
        return batch_tile
    if B >= 32:
        # Split into >= 2 grid steps so both v7x TensorCores get work.
        half = (B + 1) // 2
        return _round_up(half, 16)          # 16-sublane aligned for bf16 x tiles
    return B                                 # tiny batch: single full-extent tile


def mnist_fc_in2_forward(x_nchw, prep, *, batch_tile=512):
    """x_nchw: (B, 1, 28, 28) float32. Returns (B, num_classes) float32."""
    B = x_nchw.shape[0]
    D = 28 * 28
    ncp = prep["w3"].shape[1]                # padded classes (128)
    num_classes = prep["num_classes"]

    # bf16 x: halves the dominant HBM stream (affine already folded into W1/bias1).
    x_flat = x_nchw.reshape(B, D).astype(jnp.bfloat16)

    tb = _choose_batch_tile(B, batch_tile)
    grid = (pl.cdiv(B, tb),)

    out_padded = pl.pallas_call(
        _mlp_kernel,
        out_shape=jax.ShapeDtypeStruct((B, ncp), jnp.float32),
        grid=grid,
        in_specs=[
            pl.BlockSpec((tb, D), lambda i: (i, 0)),                 # x tile (pipelined)
            pl.BlockSpec(prep["w1"].shape, lambda i: (0, 0)),        # W1'     (resident)
            pl.BlockSpec(prep["bias1"].shape, lambda i: (0, 0)),     # bias1   (resident)
            pl.BlockSpec(prep["w2"].shape, lambda i: (0, 0)),        # W2'     (resident)
            pl.BlockSpec(prep["w3"].shape, lambda i: (0, 0)),        # W3'     (resident)
            pl.BlockSpec(prep["beta_out"].shape, lambda i: (0, 0)),  # beta_out(resident)
        ],
        out_specs=pl.BlockSpec((tb, ncp), lambda i: (i, 0)),         # lane-dense store
        compiler_params=pltpu.CompilerParams(
            dimension_semantics=("parallel",),
            vmem_limit_bytes=32 * 1024 * 1024,
        ),
    )(x_flat, prep["w1"], prep["bias1"], prep["w2"], prep["w3"],
      prep["beta_out"])

    return out_padded[:, :num_classes]


# ---------------------------------------------------------------------------
# Parameter init (deterministic synthetic; shapes follow the torch __init__)
# ---------------------------------------------------------------------------
def init_params(key, num_classes=10):
    hidden1, hidden2 = 600, 100
    k1, k2, k3, kb1, kb2 = jax.random.split(key, 5)
    # Weights stored as (in, out) == torch Linear weight (out, in) transposed.
    w1 = jax.random.normal(k1, (28 * 28, hidden1), jnp.float32) * 0.02
    w2 = jax.random.normal(k2, (hidden1, hidden2), jnp.float32) * 0.02
    w3 = jax.random.normal(k3, (hidden2, num_classes), jnp.float32) * 0.02
    return {
        "w1": w1, "w2": w2, "w3": w3,
        # InputNorm1(1, 28): gamma (1,), beta (1, 28, 28)
        "gamma_in": jnp.full((1,), 1.2, jnp.float32),
        "beta_in": jax.random.normal(kb1, (1, 28, 28), jnp.float32) * 0.01,
        # OutputNorm1(1, 10): gamma (1,), beta (1, num_classes)
        "gamma_out": jnp.full((1,), 0.95, jnp.float32),
        "beta_out": jax.random.normal(kb2, (1, num_classes), jnp.float32) * 0.01,
        # non-trivial sigmas so the scalar folding is actually exercised
        "sigma1": jnp.full((1,), 1.1, jnp.float32),
        "sigma2": jnp.full((1,), 0.9, jnp.float32),
        "sigma3": jnp.full((1,), 1.05, jnp.float32),
    }


# ---------------------------------------------------------------------------
# References
# ---------------------------------------------------------------------------
def _reference_f32(x_nchw, p):
    """Exact module semantics, pure f32."""
    B = x_nchw.shape[0]
    x = p["gamma_in"].reshape(()) * x_nchw + p["beta_in"]
    x = x.reshape(B, 28 * 28)
    x = jnp.maximum(x @ p["w1"], 0.0) * p["sigma1"].reshape(())
    x = jnp.maximum(x @ p["w2"], 0.0) * p["sigma2"].reshape(())
    x = (x @ p["w3"]) * p["sigma3"].reshape(())
    return p["gamma_out"].reshape(()) * x + p["beta_out"]


def _reference_matched(x_nchw, prep):
    """Mirrors the kernel numerics: bf16 x, folded affine/scalars, f32 acc."""
    B = x_nchw.shape[0]
    x = x_nchw.reshape(B, 28 * 28).astype(jnp.bfloat16)
    h1 = jnp.maximum(jnp.dot(x, prep["w1"], preferred_element_type=jnp.float32)
                     + prep["bias1"], 0.0)
    h2 = jnp.maximum(jnp.dot(h1.astype(jnp.bfloat16), prep["w2"],
                             preferred_element_type=jnp.float32), 0.0)
    h3 = jnp.dot(h2.astype(jnp.bfloat16), prep["w3"],
                 preferred_element_type=jnp.float32) + prep["beta_out"]
    return h3[:, :prep["num_classes"]]


# ---------------------------------------------------------------------------
if __name__ == "__main__":
    key = jax.random.PRNGKey(0)
    kx, kp = jax.random.split(key)

    B, num_classes = 8, 10
    x = jax.random.normal(kx, (B, 1, 28, 28), jnp.float32)
    params = init_params(kp, num_classes)

    prep = prepare_params(params)                 # one-time: fold / cast / pad

    out = mnist_fc_in2_forward(x, prep)
    out = jax.block_until_ready(out)

    assert out.shape == (B, num_classes)

    ref_matched = _reference_matched(x, prep)
    assert jnp.allclose(out, ref_matched, atol=1e-2, rtol=1e-2), \
        "mismatch vs bf16-matched reference"

    ref_f32 = _reference_f32(x, params)
    assert jnp.allclose(out, ref_f32, atol=5e-2, rtol=5e-2), \
        "mismatch vs pure-f32 module reference"

    print("KERNEL_OK")
</pallas_src>

<mosaic_0001>
module attributes {stable_mosaic.version = 11 : i64} {
  func.func @_mlp_kernel(%arg0: i32, %arg1: memref<8x784xbf16, #tpu.memory_space<vmem>>, %arg2: memref<784x640xbf16, #tpu.memory_space<vmem>>, %arg3: memref<1x640xf32, #tpu.memory_space<vmem>>, %arg4: memref<640x128xbf16, #tpu.memory_space<vmem>>, %arg5: memref<128x128xbf16, #tpu.memory_space<vmem>>, %arg6: memref<1x128xf32, #tpu.memory_space<vmem>>, %arg7: memref<8x128xf32, #tpu.memory_space<vmem>>) attributes {dimension_semantics = [#tpu.dimension_semantics<parallel>], iteration_bounds = array<i64: 1>, scalar_prefetch = 0 : i64, scratch_operands = 0 : i64, tpu.core_type = #tpu.core_type<tc>, window_params = [{transform_indices = @transform_0, window_bounds = array<i64: 8, 784>}, {pipeline_mode = #tpu.pipeline_mode<synchronous>, transform_indices = @transform_1, window_bounds = array<i64: 784, 640>}, {pipeline_mode = #tpu.pipeline_mode<synchronous>, transform_indices = @transform_2, window_bounds = array<i64: 1, 640>}, {pipeline_mode = #tpu.pipeline_mode<synchronous>, transform_indices = @transform_3, window_bounds = array<i64: 640, 128>}, {pipeline_mode = #tpu.pipeline_mode<synchronous>, transform_indices = @transform_4, window_bounds = array<i64: 128, 128>}, {pipeline_mode = #tpu.pipeline_mode<synchronous>, transform_indices = @transform_5, window_bounds = array<i64: 1, 128>}, {transform_indices = @transform_6, window_bounds = array<i64: 8, 128>}]} {
    %c0 = arith.constant 0 : index
    %c0_0 = arith.constant 0 : index
    %0 = vector.load %arg1[%c0, %c0_0] : memref<8x784xbf16, #tpu.memory_space<vmem>>, vector<8x784xbf16>
    %c0_1 = arith.constant 0 : index
    %c0_2 = arith.constant 0 : index
    %1 = vector.load %arg2[%c0_1, %c0_2] : memref<784x640xbf16, #tpu.memory_space<vmem>>, vector<784x640xbf16>
    %cst = arith.constant dense<0.000000e+00> : vector<8x640xf32>
    %2 = tpu.matmul %0, %1, %cst {dimension_numbers = #tpu.dot_dimension_numbers<[1], [0], [0], [1], [0, 0, 1, 1], [], []>} : vector<8x784xbf16>, vector<784x640xbf16>, vector<8x640xf32> -> vector<8x640xf32>
    %c0_3 = arith.constant 0 : index
    %c0_4 = arith.constant 0 : index
    %3 = vector.load %arg3[%c0_3, %c0_4] : memref<1x640xf32, #tpu.memory_space<vmem>>, vector<1x640xf32>
    %4 = vector.broadcast %3 : vector<1x640xf32> to vector<8x640xf32>
    %5 = arith.addf %2, %4 : vector<8x640xf32>
    %cst_5 = arith.constant 0.000000e+00 : f32
    %6 = vector.broadcast %cst_5 : f32 to vector<8x640xf32>
    %7 = arith.maximumf %5, %6 : vector<8x640xf32>
    %8 = arith.truncf %7 : vector<8x640xf32> to vector<8x640xbf16>
    %c0_6 = arith.constant 0 : index
    %c0_7 = arith.constant 0 : index
    %9 = vector.load %arg4[%c0_6, %c0_7] : memref<640x128xbf16, #tpu.memory_space<vmem>>, vector<640x128xbf16>
    %cst_8 = arith.constant dense<0.000000e+00> : vector<8x128xf32>
    %10 = tpu.matmul %8, %9, %cst_8 {dimension_numbers = #tpu.dot_dimension_numbers<[1], [0], [0], [1], [0, 0, 1, 1], [], []>} : vector<8x640xbf16>, vector<640x128xbf16>, vector<8x128xf32> -> vector<8x128xf32>
    %cst_9 = arith.constant 0.000000e+00 : f32
    %11 = vector.broadcast %cst_9 : f32 to vector<8x128xf32>
    %12 = arith.maximumf %10, %11 : vector<8x128xf32>
    %13 = arith.truncf %12 : vector<8x128xf32> to vector<8x128xbf16>
    %c0_10 = arith.constant 0 : index
    %c0_11 = arith.constant 0 : index
    %14 = vector.load %arg5[%c0_10, %c0_11] : memref<128x128xbf16, #tpu.memory_space<vmem>>, vector<128x128xbf16>
    %cst_12 = arith.constant dense<0.000000e+00> : vector<8x128xf32>
    %15 = tpu.matmul %13, %14, %cst_12 {dimension_numbers = #tpu.dot_dimension_numbers<[1], [0], [0], [1], [0, 0, 1, 1], [], []>} : vector<8x128xbf16>, vector<128x128xbf16>, vector<8x128xf32> -> vector<8x128xf32>
    %c0_13 = arith.constant 0 : index
    %c0_14 = arith.constant 0 : index
    %16 = vector.load %arg6[%c0_13, %c0_14] : memref<1x128xf32, #tpu.memory_space<vmem>>, vector<1x128xf32>
    %17 = vector.broadcast %16 : vector<1x128xf32> to vector<8x128xf32>
    %18 = arith.addf %15, %17 : vector<8x128xf32>
    %c0_15 = arith.constant 0 : index
    %c0_16 = arith.constant 0 : index
    %19 = vector.load %arg7[%c0_15, %c0_16] : memref<8x128xf32, #tpu.memory_space<vmem>>, vector<8x128xf32>
    tpu.vector_store %arg7[%c0_15, %c0_16], %18 {strides = array<i32>} : memref<8x128xf32, #tpu.memory_space<vmem>>, vector<8x128xf32>,
    return
  }
  func.func @transform_0(%arg0: i32) -> (i32, i32) {
    %c0_i32 = arith.constant 0 : i32
    %c0_i32_0 = arith.constant 0 : i32
    return %arg0, %c0_i32 : i32, i32
  }
  func.func @transform_1(%arg0: i32) -> (i32, i32) {
    %c0_i32 = arith.constant 0 : i32
    %c0_i32_0 = arith.constant 0 : i32
    %c0_i32_1 = arith.constant 0 : i32
    return %c0_i32, %c0_i32_0 : i32, i32
  }
  func.func @transform_2(%arg0: i32) -> (i32, i32) {
    %c0_i32 = arith.constant 0 : i32
    %c0_i32_0 = arith.constant 0 : i32
    %c0_i32_1 = arith.constant 0 : i32
    return %c0_i32, %c0_i32_0 : i32, i32
  }
  func.func @transform_3(%arg0: i32) -> (i32, i32) {
    %c0_i32 = arith.constant 0 : i32
    %c0_i32_0 = arith.constant 0 : i32
    %c0_i32_1 = arith.constant 0 : i32
    return %c0_i32, %c0_i32_0 : i32, i32
  }
  func.func @transform_4(%arg0: i32) -> (i32, i32) {
    %c0_i32 = arith.constant 0 : i32
    %c0_i32_0 = arith.constant 0 : i32
    %c0_i32_1 = arith.constant 0 : i32
    return %c0_i32, %c0_i32_0 : i32, i32
  }
  func.func @transform_5(%arg0: i32) -> (i32, i32) {
    %c0_i32 = arith.constant 0 : i32
    %c0_i32_0 = arith.constant 0 : i32
    %c0_i32_1 = arith.constant 0 : i32
    return %c0_i32, %c0_i32_0 : i32, i32
  }
  func.func @transform_6(%arg0: i32) -> (i32, i32) {
    %c0_i32 = arith.constant 0 : i32
    %c0_i32_0 = arith.constant 0 : i32
    return %arg0, %c0_i32 : i32, i32
  }
}

</mosaic_0001>

<bundles_post_ra>
// kernel: tpu_custom_call.1
= control target key start
LH: loop header
LB: loop body
LE: loop exit
PB: predicated region body
PF: predicated region fallthrough
CT: control target
= control target key end

     0   :  { %11 = vsyncpa [#allocation3], 0  ;;  %s4016_s0 = inlined_call_operand.hbm [shape: bf16[8,784], index: 0, kind: input, shape index: {}]   ;;  %s4017_s1 = inlined_call_operand.hbm [shape: bf16[784,640], index: 1, kind: input, shape index: {}]   ;;  %s4018_s2 = inlined_call_operand.vmem [shape: f32[1,640], index: 2, kind: input, shape index: {}]   ;;  %s4019_s3 = inlined_call_operand.hbm [shape: bf16[640,128], index: 3, kind: input, shape index: {}]   ;;  %s4020_s4 = inlined_call_operand.hbm [shape: bf16[128,128], index: 4, kind: input, shape index: {}]   ;;  %s4021_s5 = inlined_call_operand.vmem [shape: f32[1,128], index: 5, kind: input, shape index: {}]   ;;  %s4022_s6 = inlined_call_operand.hbm [shape: f32[8,128], index: 6, kind: output, shape index: {}]  }
   0x1   :  { %12 = vsyncpa [#allocation6], 0 }
   0x2   :  { %13 = vsyncpa [#allocation9], 0 }
   0x3   :  { %14 = vsyncpa [#allocation4], 0  ;;  %s3809_s21 = smov [#allocation5]   ;;  %s3691_s25 = scalar_lea.hbm %s4017_s1, 31360 }
   0x4   :  { %s30_s22 = sshll.u32 %s3809_s21, 4  ;;  %p3692_p0 = scmp.ne.s32.totalorder %s4017_s1, %s3691_s25  ;;  %s31_s22 = int_to_ptr.vmem [resolvable:$true] %s30_s22 }
   0x5   :  { %p3695_p1 = scmp.lt.u32.totalorder %s3691_s25, %s4017_s1 }
   0x7   :  { %p3697_p2 = pnand %p3695_p1, %p3692_p0 }
   0x9   :  { %3700 = shalt.err (!%p3697_p2)
}
   0xa   :  { %s3701_s30 = scalar_lea.vmem %s31_s22, 31360  ;;  %p3706_p4 = scmp.lt.s32.totalorder %s31_s22, %s31_s22 }
   0xb   :  { %p3702_p3 = scmp.ne.s32.totalorder %s31_s22, %s3701_s30  ;;  %p3707_p5 = scmp.lt.s32.totalorder %s3701_s30, %s3701_s30 }
   0xd   :  { %p3708_p6 = por %p3707_p5, %p3706_p4 }
   0xf   :  { %p3709_p7 = pnand %p3708_p6, %p3702_p3 }
  0x11   :  { %3712 = shalt.err (!%p3709_p7)
}
  0x12   :  { %s3810_s7 = smov 320   ;;  %s3811_s8 = smov 20  }
  0x13   :  { %36 = dma.hbm_to_vmem [thread:$0]  %s4017_s1, 31360, %s31_s22, [#allocation6], %s3810_s7, %s3810_s7, %s3811_s8  }
  0x14   :  { %s3812_s11 = smov [#allocation2]   ;;  %s3813_s13 = smov [#allocation7]  }
  0x15   :  { %s21_s12 = sshll.u32 %s3812_s11, 4  ;;  %s44_s14 = sshll.u32 %s3813_s13, 4  ;;  %s22_s12 = int_to_ptr.vmem [resolvable:$true] %s21_s12  ;;  %s45_s14 = int_to_ptr.vmem [resolvable:$true] %s44_s14 }
  0x16   :  { %s3713_s17 = scalar_lea.hbm %s4016_s0, 448 }
  0x17   :  { %p3714_p8 = scmp.ne.s32.totalorder %s4016_s0, %s3713_s17  ;;  %p3717_p9 = scmp.lt.u32.totalorder %s3713_s17, %s4016_s0 }
  0x19   :  { %p3719_p10 = pnand %p3717_p9, %p3714_p8 }
  0x1b   :  { %3722 = shalt.err (!%p3719_p10)
}
  0x1c   :  { %s3723_s1 = scalar_lea.vmem %s22_s12, 448  ;;  %p3728_p12 = scmp.lt.s32.totalorder %s22_s12, %s22_s12 }
  0x1d   :  { %p3724_p11 = scmp.ne.s32.totalorder %s22_s12, %s3723_s1  ;;  %p3729_p13 = scmp.lt.s32.totalorder %s3723_s1, %s3723_s1 }
  0x1f   :  { %p3730_p0 = por %p3729_p13, %p3728_p12 }
  0x21   :  { %p3731_p1 = pnand %p3730_p0, %p3724_p11 }
  0x23   :  { %3734 = shalt.err (!%p3731_p1)
}
  0x24   :  { %24 = dma.hbm_to_vmem [thread:$0]  %s4016_s0, 448, %s22_s12, [#allocation3]  }
  0x25   :  { %s3735_s26 = scalar_lea.hbm %s4019_s3, 5120 }
  0x26   :  { %p3736_p2 = scmp.ne.s32.totalorder %s4019_s3, %s3735_s26  ;;  %p3739_p3 = scmp.lt.u32.totalorder %s3735_s26, %s4019_s3 }
  0x28   :  { %p3741_p4 = pnand %p3739_p3, %p3736_p2 }
  0x2a   :  { %3744 = shalt.err (!%p3741_p4)
}
  0x2b   :  { %s3745_s7 = scalar_lea.vmem %s45_s14, 5120  ;;  %p3750_p6 = scmp.lt.s32.totalorder %s45_s14, %s45_s14 }
  0x2c   :  { %p3746_p5 = scmp.ne.s32.totalorder %s45_s14, %s3745_s7  ;;  %p3751_p7 = scmp.lt.s32.totalorder %s3745_s7, %s3745_s7 }
  0x2e   :  { %p3752_p8 = por %p3751_p7, %p3750_p6 }
  0x30   :  { %p3753_p9 = pnand %p3752_p8, %p3746_p5 }
  0x32   :  { %3756 = shalt.err (!%p3753_p9)
}
  0x33   :  { %s3814_s0 = smov 64   ;;  %s3815_s8 = smov 4  }
  0x34   :  { %50 = dma.hbm_to_vmem [thread:$0]  %s4019_s3, 5120, %s45_s14, [#allocation6], %s3814_s0, %s3814_s0, %s3815_s8  }
  0x35   :  { %s3816_s11 = smov [#allocation8]   ;;  %s3757_s16 = scalar_lea.hbm %s4020_s4, 1024 }
  0x36   :  { %s56_s12 = sshll.u32 %s3816_s11, 4  ;;  %p3758_p10 = scmp.ne.s32.totalorder %s4020_s4, %s3757_s16  ;;  %s57_s12 = int_to_ptr.vmem [resolvable:$true] %s56_s12 }
  0x37   :  { %p3761_p11 = scmp.lt.u32.totalorder %s3757_s16, %s4020_s4 }
  0x39   :  { %p3763_p12 = pnand %p3761_p11, %p3758_p10 }
  0x3b   :  { %3766 = shalt.err (!%p3763_p12)
}
  0x3c   :  { %s3767_s21 = scalar_lea.vmem %s57_s12, 1024  ;;  %p3772_p0 = scmp.lt.s32.totalorder %s57_s12, %s57_s12 }
  0x3d   :  { %p3768_p13 = scmp.ne.s32.totalorder %s57_s12, %s3767_s21  ;;  %p3773_p1 = scmp.lt.s32.totalorder %s3767_s21, %s3767_s21 }
  0x3f   :  { %p3774_p2 = por %p3773_p1, %p3772_p0 }
  0x41   :  { %p3775_p3 = pnand %p3774_p2, %p3768_p13 }
  0x43   :  { %3778 = shalt.err (!%p3775_p3)
}
  0x44   :  { %62 = dma.hbm_to_vmem [thread:$0]  %s4020_s4, 1024, %s57_s12, [#allocation9], %s3814_s0, %s3814_s0, %s3815_s8  }
  0x45   :  { %3801 = dma.done.wait [#allocation3], 448  }
  0x46   :  { %3802 = vsyncadd [#allocation3], 4294966848 }
  0x47   :  { %3803 = dma.done.wait [#allocation6], 36480  }
  0x48   :  { %3804 = vsyncadd [#allocation6], 4294930816 }
  0x49   :  { %3805 = dma.done.wait [#allocation9], 1024  }
  0x4a   :  { %3806 = vsyncadd [#allocation9], 4294966272  ;;  %v3817_v0 = vmov 0   ;;  %v3292_v1 = vld [vmem:[#allocation5 + $0x4] ss:$20 sps:$4 sm:$0xff]   ;;  %vm1701_vm0 = vcmask 130048  }
  0x4b   :  { %1860 = vmatprep.mubr.bf16.mxu1 %v3817_v0  ;;  %v3294_v2 = vld [vmem:[#allocation5 + $0x784] ss:$20 sps:$4 sm:$0xff]   ;;  %1705 = vmatprep.subr.bf16.mxu0 %v3292_v1  ;;  %v3296_v3 = vld [vmem:[#allocation5] ss:$20 sps:$4 sm:$0xff]   ;;  %v3300_v6 = vld [vmem:[#allocation5 + $0x8] ss:$20 sps:$4 sm:$0xff]  }
  0x4c   :  { %v3297_v4 = vld [vmem:[#allocation5 + $0x780] ss:$20 sps:$4 sm:$0xff]   ;;  %1828 = vmatprep.subr.bf16.mxu1 %v3294_v2  ;;  %1706 = vmatpush1.bf16.msra.mxu0 %v3296_v3  ;;  %v3303_v8 = vld [vmem:[#allocation5 + $0x28] ss:$20 sps:$4 sm:$0xff]   ;;  %v3307_v11 = vld [vmem:[#allocation5 + $0x30] ss:$20 sps:$4 sm:$0xff]  }
  0x4d   :  { %v3298_v5 = vld [vmem:[#allocation5 + $0x2c] ss:$20 sps:$4 sm:$0xff]   ;;  %1829 = vmatpush1.bf16.msra.mxu1 %v3297_v4  ;;  %v3304_v9 = vld [vmem:[#allocation2 + $0x18] ss:$0 sps:$4 sm:$0xff]   ;;  %v3305_v10 = vld [vmem:[#allocation5 + $0x54] ss:$20 sps:$4 sm:$0xff]  }
  0x4e   :  { %v3302_v7 = vld [vmem:[#allocation5 + $0xc] ss:$20 sps:$4 sm:$0xff]   ;;  %1707 = vmatprep.subr.bf16.mxu0 %v3298_v5  ;;  %v3309_v12 = vld [vmem:[#allocation5 + $0x34] ss:$20 sps:$4 sm:$0xff]   ;;  %v3310_v13 = vld [vmem:[#allocation5 + $0x50] ss:$20 sps:$4 sm:$0xff]  }
  0x4f   :  { %1869 = vmatprep.subr.bf16.mxu1 %v3302_v7  ;;  %v3311_v14 = vld [vmem:[#allocation5 + $0x7c] ss:$20 sps:$4 sm:$0xff]   ;;  %v3313_v16 = vld [vmem:[#allocation5 + $0x58] ss:$20 sps:$4 sm:$0xff]   ;;  %v3319_v20 = vld [vmem:[#allocation5 + $0x80] ss:$20 sps:$4 sm:$0xff]  }
  0x50   :  { %3026 = vmatmul.mubr.msk.bf16.vlgmr.msra.gmra.mrb[0].mxu1 %vm1701_vm0, %v3304_v9  ;;  %1708 = vmatpush1.bf16.msra.mxu0 %v3303_v8  ;;  %v3315_v15 = vld [vmem:[#allocation5 + $0x5c] ss:$20 sps:$4 sm:$0xff]   ;;  %v3316_v17 = vld [vmem:[#allocation5 + $0x78] ss:$20 sps:$4 sm:$0xff]   ;;  %v3322_v21 = vld [vmem:[#allocation5 + $0xa0] ss:$20 sps:$4 sm:$0xff]  }
  0x51   :  { %1870 = vmatpush1.bf16.msra.mxu1 %v3300_v6  ;;  %1709 = vmatprep.subr.bf16.mxu0 %v3305_v10  ;;  %v3317_v18 = vld [vmem:[#allocation5 + $0xa4] ss:$20 sps:$4 sm:$0xff]   ;;  %v3323_v22 = vld [vmem:[#allocation5 + $0xcc] ss:$20 sps:$4 sm:$0xff]   ;;  %v3325_v24 = vld [vmem:[#allocation5 + $0xa8] ss:$20 sps:$4 sm:$0xff]  }
  0x52   :  { %1871 = vmatprep.subr.bf16.mxu1 %v3309_v12  ;;  %v3321_v19 = vld [vmem:[#allocation5 + $0x84] ss:$20 sps:$4 sm:$0xff]   ;;  %v3327_v23 = vld [vmem:[#allocation5 + $0xac] ss:$20 sps:$4 sm:$0xff]   ;;  %v3328_v25 = vld [vmem:[#allocation5 + $0xc8] ss:$20 sps:$4 sm:$0xff]  }
  0x53   :  { %v3329_v26 = vld [vmem:[#allocation5 + $0xf4] ss:$20 sps:$4 sm:$0xff]   ;;  %v3331_v28 = vld [vmem:[#allocation5 + $0xd0] ss:$20 sps:$4 sm:$0xff]   ;;  %v3337_v32 = vld [vmem:[#allocation5 + $0xf8] ss:$20 sps:$4 sm:$0xff]  }
  0x54   :  { %1710 = vmatpush1.bf16.msra.mxu0 %v3310_v13  ;;  %v3333_v27 = vld [vmem:[#allocation5 + $0xd4] ss:$20 sps:$4 sm:$0xff]   ;;  %v3334_v29 = vld [vmem:[#allocation5 + $0xf0] ss:$20 sps:$4 sm:$0xff]   ;;  %v3340_v33 = vld [vmem:[#allocation5 + $0x118] ss:$20 sps:$4 sm:$0xff]  }
  0x55   :  { %1872 = vmatpush1.bf16.msra.mxu1 %v3307_v11  ;;  %1711 = vmatprep.subr.bf16.mxu0 %v3311_v14  ;;  %v3335_v30 = vld [vmem:[#allocation5 + $0x11c] ss:$20 sps:$4 sm:$0xff]   ;;  %v3341_v34 = vld [vmem:[#allocation5 + $0x144] ss:$20 sps:$4 sm:$0xff]   ;;  %v3343_v36 = vld [vmem:[#allocation5 + $0x120] ss:$20 sps:$4 sm:$0xff]  }
  0x56   :  { %1873 = vmatprep.subr.bf16.mxu1 %v3315_v15  ;;  %v3339_v31 = vld [vmem:[#allocation5 + $0xfc] ss:$20 sps:$4 sm:$0xff]   ;;  %v3345_v35 = vld [vmem:[#allocation5 + $0x124] ss:$20 sps:$4 sm:$0xff]   ;;  %v3346_v37 = vld [vmem:[#allocation5 + $0x140] ss:$20 sps:$4 sm:$0xff]  }
  0x57   :  { %v3347_v38 = vld [vmem:[#allocation5 + $0x16c] ss:$20 sps:$4 sm:$0xff]   ;;  %v3349_v40 = vld [vmem:[#allocation5 + $0x148] ss:$20 sps:$4 sm:$0xff]   ;;  %v3355_v44 = vld [vmem:[#allocation5 + $0x170] ss:$20 sps:$4 sm:$0xff]  }
  0x58   :  { %1712 = vmatpush1.bf16.msra.mxu0 %v3316_v17  ;;  %v3351_v39 = vld [vmem:[#allocation5 + $0x14c] ss:$20 sps:$4 sm:$0xff]   ;;  %v3352_v41 = vld [vmem:[#allocation5 + $0x168] ss:$20 sps:$4 sm:$0xff]   ;;  %v3358_v45 = vld [vmem:[#allocation5 + $0x190] ss:$20 sps:$4 sm:$0xff]  }
  0x59   :  { %1874 = vmatpush1.bf16.msra.mxu1 %v3313_v16  ;;  %1713 = vmatprep.subr.bf16.mxu0 %v3317_v18  ;;  %v3353_v42 = vld [vmem:[#allocation5 + $0x194] ss:$20 sps:$4 sm:$0xff]   ;;  %v3359_v46 = vld [vmem:[#allocation5 + $0x1bc] ss:$20 sps:$4 sm:$0xff]   ;;  %v3361_v48 = vld [vmem:[#allocation5 + $0x198] ss:$20 sps:$4 sm:$0xff]  }
  0x5a   :  { %1875 = vmatprep.subr.bf16.mxu1 %v3321_v19  ;;  %v3357_v43 = vld [vmem:[#allocation5 + $0x174] ss:$20 sps:$4 sm:$0xff]   ;;  %v3363_v47 = vld [vmem:[#allocation5 + $0x19c] ss:$20 sps:$4 sm:$0xff]   ;;  %v3364_v50 = vld [vmem:[#allocation5 + $0x1b8] ss:$20 sps:$4 sm:$0xff]  }
  0x5b   :  { %v78_v49 = vld [vmem:[#allocation2] sm:$0xff]  ;;  %v3367_v54 = vld [vmem:[#allocation5 + $0x1c0] ss:$20 sps:$4 sm:$0xff]   ;;  %v3383_v1 = vld [vmem:[#allocation5 + $0x25c] ss:$20 sps:$4 sm:$0xff]   ;;  %vm3819_vm1 = vmmov 0  }
  0x5c   :  { %1714 = vmatpush1.bf16.msra.mxu0 %v3322_v21  ;;  %v3365_v51 = vld [vmem:[#allocation5 + $0x1e4] ss:$20 sps:$4 sm:$0xff]   ;;  %v3906_v52 = vcombine.high %v78_v49, %v78_v49  ;;  %v3370_v55 = vld [vmem:[#allocation5 + $0x1e0] ss:$20 sps:$4 sm:$0xff]   ;;  %v3373_v58 = vld [vmem:[#allocation5 + $0x1e8] ss:$20 sps:$4 sm:$0xff]   ;;  %v3910_v8 = vcombine.low %v78_v49, %v78_v49 }
  0x5d   :  { %1876 = vmatpush1.bf16.msra.mxu1 %v3319_v20  ;;  %1715 = vmatprep.subr.bf16.mxu0 %v3323_v22  ;;  %v3369_v53 = vld [vmem:[#allocation5 + $0x1c4] ss:$20 sps:$4 sm:$0xff]   ;;  %v3371_v56 = vld [vmem:[#allocation5 + $0x20c] ss:$20 sps:$4 sm:$0xff]   ;;  %v3376_v59 = vld [vmem:[#allocation5 + $0x208] ss:$20 sps:$4 sm:$0xff]  }
  0x5e   :  { %1877 = vmatprep.subr.bf16.mxu1 %v3327_v23  ;;  %1737 = vmatprep.mubr.bf16.mxu0 %v3906_v52  ;;  %v3375_v57 = vld [vmem:[#allocation5 + $0x1ec] ss:$20 sps:$4 sm:$0xff]   ;;  %v3377_v60 = vld [vmem:[#allocation5 + $0x234] ss:$20 sps:$4 sm:$0xff]   ;;  %v3379_v62 = vld [vmem:[#allocation5 + $0x210] ss:$20 sps:$4 sm:$0xff]  }
  0x5f   :  { %1901 = vmatprep.mubr.bf16.mxu1 %v3906_v52  ;;  %v3381_v61 = vld [vmem:[#allocation5 + $0x214] ss:$20 sps:$4 sm:$0xff]   ;;  %v3382_v63 = vld [vmem:[#allocation5 + $0x230] ss:$20 sps:$4 sm:$0xff]   ;;  %v3385_v3 = vld [vmem:[#allocation5 + $0x238] ss:$20 sps:$4 sm:$0xff]  }
  0x60   :  { %1716 = vmatpush1.bf16.msra.mxu0 %v3328_v25  ;;  %v3387_v2 = vld [vmem:[#allocation5 + $0x23c] ss:$20 sps:$4 sm:$0xff]   ;;  %v3388_v4 = vld [vmem:[#allocation5 + $0x258] ss:$20 sps:$4 sm:$0xff]   ;;  %v3390_v7 = vld [vmem:[#allocation5 + $0x280] ss:$20 sps:$4 sm:$0xff]  }
  0x61   :  { %1878 = vmatpush1.bf16.msra.mxu1 %v3325_v24  ;;  %1717 = vmatprep.subr.bf16.mxu0 %v3329_v26  ;;  %v3392_v5 = vld [vmem:[#allocation5 + $0x284] ss:$20 sps:$4 sm:$0xff]   ;;  %v3393_v9 = vld [vmem:[#allocation5 + $0x260] ss:$20 sps:$4 sm:$0xff]   ;;  %v3397_v12 = vld [vmem:[#allocation5 + $0x2a8] ss:$20 sps:$4 sm:$0xff]  }
  0x62   :  { %1879 = vmatprep.subr.bf16.mxu1 %v3333_v27  ;;  %v3395_v6 = vld [vmem:[#allocation5 + $0x264] ss:$20 sps:$4 sm:$0xff]   ;;  %v3399_v10 = vld [vmem:[#allocation5 + $0x2ac] ss:$20 sps:$4 sm:$0xff]   ;;  %v3400_v13 = vld [vmem:[#allocation5 + $0x288] ss:$20 sps:$4 sm:$0xff]  }
  0x63   :  { %v3402_v11 = vld [vmem:[#allocation5 + $0x28c] ss:$20 sps:$4 sm:$0xff]   ;;  %v3405_v14 = vld [vmem:[#allocation5 + $0x2d4] ss:$20 sps:$4 sm:$0xff]   ;;  %v3403_v16 = vld [vmem:[#allocation5 + $0x2d0] ss:$20 sps:$4 sm:$0xff]  }
  0x64   :  { %1718 = vmatpush1.bf16.msra.mxu0 %v3334_v29  ;;  %v3408_v15 = vld [vmem:[#allocation5 + $0x2b4] ss:$20 sps:$4 sm:$0xff]   ;;  %v3406_v17 = vld [vmem:[#allocation5 + $0x2b0] ss:$20 sps:$4 sm:$0xff]   ;;  %v3409_v20 = vld [vmem:[#allocation5 + $0x2f8] ss:$20 sps:$4 sm:$0xff]  }
  0x65   :  { %1880 = vmatpush1.bf16.msra.mxu1 %v3331_v28  ;;  %1719 = vmatprep.subr.bf16.mxu0 %v3335_v30  ;;  %v3411_v18 = vld [vmem:[#allocation5 + $0x2fc] ss:$20 sps:$4 sm:$0xff]   ;;  %v3412_v21 = vld [vmem:[#allocation5 + $0x2d8] ss:$20 sps:$4 sm:$0xff]   ;;  %v3415_v24 = vld [vmem:[#allocation5 + $0x320] ss:$20 sps:$4 sm:$0xff]  }
  0x66   :  { %1881 = vmatprep.subr.bf16.mxu1 %v3339_v31  ;;  %v3414_v19 = vld [vmem:[#allocation5 + $0x2dc] ss:$20 sps:$4 sm:$0xff]   ;;  %v3417_v22 = vld [vmem:[#allocation5 + $0x324] ss:$20 sps:$4 sm:$0xff]   ;;  %v3418_v25 = vld [vmem:[#allocation5 + $0x300] ss:$20 sps:$4 sm:$0xff]  }
  0x67   :  { %v3420_v23 = vld [vmem:[#allocation5 + $0x304] ss:$20 sps:$4 sm:$0xff]   ;;  %v3423_v26 = vld [vmem:[#allocation5 + $0x34c] ss:$20 sps:$4 sm:$0xff]   ;;  %v3421_v28 = vld [vmem:[#allocation5 + $0x348] ss:$20 sps:$4 sm:$0xff]  }
  0x68   :  { %1720 = vmatpush1.bf16.msra.mxu0 %v3340_v33  ;;  %v3426_v27 = vld [vmem:[#allocation5 + $0x32c] ss:$20 sps:$4 sm:$0xff]   ;;  %v3424_v29 = vld [vmem:[#allocation5 + $0x328] ss:$20 sps:$4 sm:$0xff]   ;;  %v3427_v33 = vld [vmem:[#allocation5 + $0x370] ss:$20 sps:$4 sm:$0xff]  }
  0x69   :  { %1882 = vmatpush1.bf16.msra.mxu1 %v3337_v32  ;;  %1721 = vmatprep.subr.bf16.mxu0 %v3341_v34  ;;  %v3429_v30 = vld [vmem:[#allocation5 + $0x374] ss:$20 sps:$4 sm:$0xff]   ;;  %v3914_v32 = vld [vmem:[#allocation2 + $0x8] sm:$0xff]  ;;  %s3820_s23 = smov [#allocation10]  }
  0x6a   :  { %1883 = vmatprep.subr.bf16.mxu1 %v3345_v35  ;;  %v3432_v31 = vld [vmem:[#allocation5 + $0x354] ss:$20 sps:$4 sm:$0xff]   ;;  %v3430_v34 = vld [vmem:[#allocation5 + $0x350] ss:$20 sps:$4 sm:$0xff]   ;;  %v3918_v35 = vcombine.high %v3914_v32, %v3914_v32  ;;  %s2763_s24 = sshll.u32 %s3820_s23, 4  ;;  %s2764_s24 = int_to_ptr.vmem [resolvable:$true] %s2763_s24 }
  0x6b   :  { %v3456_v49 = vld [vmem:[#allocation5 + $0x3f4] ss:$20 sps:$4 sm:$0xff]   ;;  %s3779_s25 = scalar_lea.vmem %s2764_s24, 128  ;;  %p3784_p5 = scmp.lt.s32.totalorder %s2764_s24, %s2764_s24 }
  0x6c   :  { %1722 = vmatpush1.bf16.msra.mxu0 %v3346_v37  ;;  %v3438_v37 = vld [vmem:[#allocation5 + $0x37c] ss:$20 sps:$4 sm:$0xff]   ;;  %p3780_p4 = scmp.ne.s32.totalorder %s2764_s24, %s3779_s25  ;;  %p3785_p6 = scmp.lt.s32.totalorder %s3779_s25, %s3779_s25 }
  0x6d   :  { %1884 = vmatpush1.bf16.msra.mxu1 %v3343_v36  ;;  %1723 = vmatprep.subr.bf16.mxu0 %v3347_v38  ;;  %v3435_v36 = vld [vmem:[#allocation5 + $0x39c] ss:$20 sps:$4 sm:$0xff]   ;;  %v3433_v38 = vld [vmem:[#allocation5 + $0x398] ss:$20 sps:$4 sm:$0xff]  }
  0x6e   :  { %1885 = vmatprep.subr.bf16.mxu1 %v3351_v39  ;;  %v3436_v39 = vld [vmem:[#allocation5 + $0x378] ss:$20 sps:$4 sm:$0xff]   ;;  %p3786_p7 = por %p3785_p6, %p3784_p5 }
  0x70   :  { %1724 = vmatpush1.bf16.msra.mxu0 %v3352_v41  ;;  %v3444_v41 = vld [vmem:[#allocation5 + $0x3a4] ss:$20 sps:$4 sm:$0xff]   ;;  %p3787_p8 = pnand %p3786_p7, %p3780_p4 }
  0x71   :  { %1886 = vmatpush1.bf16.msra.mxu1 %v3349_v40  ;;  %1725 = vmatprep.subr.bf16.mxu0 %v3353_v42  ;;  %v3441_v40 = vld [vmem:[#allocation5 + $0x3c4] ss:$20 sps:$4 sm:$0xff]   ;;  %v3439_v42 = vld [vmem:[#allocation5 + $0x3c0] ss:$20 sps:$4 sm:$0xff]  }
  0x72   :  { %1887 = vmatprep.subr.bf16.mxu1 %v3357_v43  ;;  %v3442_v43 = vld [vmem:[#allocation5 + $0x3a0] ss:$20 sps:$4 sm:$0xff]  }
  0x74   :  { %1726 = vmatpush1.bf16.msra.mxu0 %v3358_v45  ;;  %v3450_v45 = vld [vmem:[#allocation5 + $0x3cc] ss:$20 sps:$4 sm:$0xff]  }
  0x75   :  { %1888 = vmatpush1.bf16.msra.mxu1 %v3355_v44  ;;  %1727 = vmatprep.subr.bf16.mxu0 %v3359_v46  ;;  %v3447_v44 = vld [vmem:[#allocation5 + $0x3ec] ss:$20 sps:$4 sm:$0xff]   ;;  %v3445_v46 = vld [vmem:[#allocation5 + $0x3e8] ss:$20 sps:$4 sm:$0xff]  }
  0x76   :  { %1889 = vmatprep.subr.bf16.mxu1 %v3363_v47  ;;  %v3448_v47 = vld [vmem:[#allocation5 + $0x3c8] ss:$20 sps:$4 sm:$0xff]  }
  0x78   :  { %1728 = vmatpush1.bf16.msra.mxu0 %v3364_v50  ;;  %v3451_v50 = vld [vmem:[#allocation5 + $0x410] ss:$20 sps:$4 sm:$0xff]  }
  0x79   :  { %1890 = vmatpush1.bf16.msra.mxu1 %v3361_v48  ;;  %1729 = vmatprep.subr.bf16.mxu0 %v3365_v51  ;;  %v3453_v48 = vld [vmem:[#allocation5 + $0x414] ss:$20 sps:$4 sm:$0xff]   ;;  %v3454_v51 = vld [vmem:[#allocation5 + $0x3f0] ss:$20 sps:$4 sm:$0xff]  }
  0x7a   :  { %1891 = vmatprep.subr.bf16.mxu1 %v3369_v53  ;;  %v3459_v53 = vld [vmem:[#allocation5 + $0x43c] ss:$20 sps:$4 sm:$0xff]  }
  0x7c   :  { %1730 = vmatpush1.bf16.msra.mxu0 %v3370_v55  ;;  %v3457_v55 = vld [vmem:[#allocation5 + $0x438] ss:$20 sps:$4 sm:$0xff]  }
  0x7d   :  { %1892 = vmatpush1.bf16.msra.mxu1 %v3367_v54  ;;  %1731 = vmatprep.subr.bf16.mxu0 %v3371_v56  ;;  %v3462_v54 = vld [vmem:[#allocation5 + $0x41c] ss:$20 sps:$4 sm:$0xff]   ;;  %v3460_v56 = vld [vmem:[#allocation5 + $0x418] ss:$20 sps:$4 sm:$0xff]  }
  0x7e   :  { %1893 = vmatprep.subr.bf16.mxu1 %v3375_v57  ;;  %v3465_v57 = vld [vmem:[#allocation5 + $0x464] ss:$20 sps:$4 sm:$0xff]  }
  0x80   :  { %1732 = vmatpush1.bf16.msra.mxu0 %v3376_v59  ;;  %v3463_v59 = vld [vmem:[#allocation5 + $0x460] ss:$20 sps:$4 sm:$0xff]  }
  0x81   :  { %1894 = vmatpush1.bf16.msra.mxu1 %v3373_v58  ;;  %1733 = vmatprep.subr.bf16.mxu0 %v3377_v60  ;;  %v3468_v58 = vld [vmem:[#allocation5 + $0x444] ss:$20 sps:$4 sm:$0xff]   ;;  %v3466_v60 = vld [vmem:[#allocation5 + $0x440] ss:$20 sps:$4 sm:$0xff]  }
  0x82   :  { %1895 = vmatprep.subr.bf16.mxu1 %v3381_v61  ;;  %v3471_v61 = vld [vmem:[#allocation5 + $0x48c] ss:$20 sps:$4 sm:$0xff]  }
  0x84   :  { %1734 = vmatpush1.bf16.msra.mxu0 %v3382_v63  ;;  %v3469_v63 = vld [vmem:[#allocation5 + $0x488] ss:$20 sps:$4 sm:$0xff]  }
  0x85   :  { %1896 = vmatpush1.bf16.msra.mxu1 %v3379_v62  ;;  %1735 = vmatprep.subr.bf16.mxu0 %v3383_v1  ;;  %v3474_v62 = vld [vmem:[#allocation5 + $0x46c] ss:$20 sps:$4 sm:$0xff]   ;;  %v3472_v1 = vld [vmem:[#allocation5 + $0x468] ss:$20 sps:$4 sm:$0xff]  }
  0x86   :  { %1897 = vmatprep.subr.bf16.mxu1 %v3387_v2  ;;  %v3477_v2 = vld [vmem:[#allocation5 + $0x4b4] ss:$20 sps:$4 sm:$0xff]  }
  0x88   :  { %1736 = vmatpush1.bf16.msra.mxu0 %v3388_v4  ;;  %v3475_v4 = vld [vmem:[#allocation5 + $0x4b0] ss:$20 sps:$4 sm:$0xff]  }
  0x89   :  { %1898 = vmatpush1.bf16.msra.mxu1 %v3385_v3  ;;  %1746 = vmatprep.subr.bf16.mxu0 %v3392_v5  ;;  %v3480_v3 = vld [vmem:[#allocation5 + $0x494] ss:$20 sps:$4 sm:$0xff]   ;;  %v3478_v5 = vld [vmem:[#allocation5 + $0x490] ss:$20 sps:$4 sm:$0xff]  }
  0x8a   :  { %1899 = vmatprep.subr.bf16.mxu1 %v3395_v6  ;;  %v3483_v6 = vld [vmem:[#allocation5 + $0x4dc] ss:$20 sps:$4 sm:$0xff]  }
  0x8b   :  { %1738 = vmatmul.mubr.bf16.vlgmr.msra.gmra.mrb[0].mxu0 %v3910_v8 }
  0x8c   :  { %1747 = vmatpush1.bf16.msra.mxu0 %v3390_v7  ;;  %1778 = vmatprep.mubr.bf16.mxu0 %v3918_v35  ;;  %v3486_v7 = vld [vmem:[#allocation5 + $0x4bc] ss:$20 sps:$4 sm:$0xff]  }
  0x8d   :  { %1900 = vmatpush1.bf16.msra.mxu1 %v3393_v9  ;;  %1748 = vmatprep.subr.bf16.mxu0 %v3399_v10  ;;  %v3481_v9 = vld [vmem:[#allocation5 + $0x4d8] ss:$20 sps:$4 sm:$0xff]  }
  0x8e   :  { %1910 = vmatprep.subr.bf16.mxu1 %v3402_v11  ;;  %v3484_v10 = vld [vmem:[#allocation5 + $0x4b8] ss:$20 sps:$4 sm:$0xff]  }
  0x8f   :  { %v3491_v11 = vld [vmem:[#allocation5 + $0x504] ss:$20 sps:$4 sm:$0xff]  }
  0x90   :  { %1902 = vmatmul.mubr.bf16.vlgmr.msra.gmra.mrb[4].mxu1 %v3910_v8  ;;  %1749 = vmatpush1.bf16.msra.mxu0 %v3397_v12  ;;  %v3494_v12 = vld [vmem:[#allocation5 + $0x4e4] ss:$20 sps:$4 sm:$0xff]  }
  0x91   :  { %1911 = vmatpush1.bf16.msra.mxu1 %v3400_v13  ;;  %1750 = vmatprep.subr.bf16.mxu0 %v3405_v14  ;;  %v3924_v13 = vcombine.low %v3914_v32, %v3914_v32  ;;  %v3489_v14 = vld [vmem:[#allocation5 + $0x500] ss:$20 sps:$4 sm:$0xff]  }
  0x92   :  { %1912 = vmatprep.subr.bf16.mxu1 %v3408_v15  ;;  %1942 = vmatprep.mubr.bf16.mxu1 %v3918_v35  ;;  %v3492_v15 = vld [vmem:[#allocation5 + $0x4e0] ss:$20 sps:$4 sm:$0xff]  }
  0x93   :  { %v3513_v32 = vld [vmem:[#allocation5 + $0x5a0] ss:$20 sps:$4 sm:$0xff]  }
  0x94   :  { %1751 = vmatpush1.bf16.msra.mxu0 %v3403_v16  ;;  %v3497_v16 = vld [vmem:[#allocation5 + $0x52c] ss:$20 sps:$4 sm:$0xff]  }
  0x95   :  { %1913 = vmatpush1.bf16.msra.mxu1 %v3406_v17  ;;  %1752 = vmatprep.subr.bf16.mxu0 %v3411_v18  ;;  %v3500_v17 = vld [vmem:[#allocation5 + $0x50c] ss:$20 sps:$4 sm:$0xff]   ;;  %v3926_v18 = vld [vmem:[#allocation2 + $0x10] sm:$0xff] }
  0x96   :  { %1914 = vmatprep.subr.bf16.mxu1 %v3414_v19  ;;  %v3495_v19 = vld [vmem:[#allocation5 + $0x528] ss:$20 sps:$4 sm:$0xff]  }
  0x98   :  { %1753 = vmatpush1.bf16.msra.mxu0 %v3409_v20  ;;  %v3930_v20 = vcombine.high %v3926_v18, %v3926_v18 }
  0x99   :  { %1915 = vmatpush1.bf16.msra.mxu1 %v3412_v21  ;;  %1754 = vmatprep.subr.bf16.mxu0 %v3417_v22  ;;  %v3498_v21 = vld [vmem:[#allocation5 + $0x508] ss:$20 sps:$4 sm:$0xff]  }
  0x9a   :  { %1916 = vmatprep.subr.bf16.mxu1 %v3420_v23  ;;  %v3503_v22 = vld [vmem:[#allocation5 + $0x554] ss:$20 sps:$4 sm:$0xff]  }
  0x9b   :  { %v3506_v23 = vld [vmem:[#allocation5 + $0x534] ss:$20 sps:$4 sm:$0xff]  }
  0x9c   :  { %1755 = vmatpush1.bf16.msra.mxu0 %v3415_v24  ;;  %v3501_v24 = vld [vmem:[#allocation5 + $0x550] ss:$20 sps:$4 sm:$0xff]  }
  0x9d   :  { %1917 = vmatpush1.bf16.msra.mxu1 %v3418_v25  ;;  %1756 = vmatprep.subr.bf16.mxu0 %v3423_v26  ;;  %v3504_v25 = vld [vmem:[#allocation5 + $0x530] ss:$20 sps:$4 sm:$0xff]  }
  0x9e   :  { %1918 = vmatprep.subr.bf16.mxu1 %v3426_v27  ;;  %v3509_v26 = vld [vmem:[#allocation5 + $0x57c] ss:$20 sps:$4 sm:$0xff]  }
  0x9f   :  { %v3512_v27 = vld [vmem:[#allocation5 + $0x55c] ss:$20 sps:$4 sm:$0xff]  }
  0xa0   :  { %1757 = vmatpush1.bf16.msra.mxu0 %v3421_v28  ;;  %v3507_v28 = vld [vmem:[#allocation5 + $0x578] ss:$20 sps:$4 sm:$0xff]  }
  0xa1   :  { %1919 = vmatpush1.bf16.msra.mxu1 %v3424_v29  ;;  %1758 = vmatprep.subr.bf16.mxu0 %v3429_v30  ;;  %v3510_v29 = vld [vmem:[#allocation5 + $0x558] ss:$20 sps:$4 sm:$0xff]  }
  0xa2   :  { %1920 = vmatprep.subr.bf16.mxu1 %v3432_v31  ;;  %v3515_v30 = vld [vmem:[#allocation5 + $0x5a4] ss:$20 sps:$4 sm:$0xff]  }
  0xa3   :  { %v3518_v31 = vld [vmem:[#allocation5 + $0x584] ss:$20 sps:$4 sm:$0xff]  }
  0xa4   :  { %1759 = vmatpush1.bf16.msra.mxu0 %v3427_v33  ;;  %v3516_v33 = vld [vmem:[#allocation5 + $0x580] ss:$20 sps:$4 sm:$0xff]  }
  0xa5   :  { %1921 = vmatpush1.bf16.msra.mxu1 %v3430_v34  ;;  %1760 = vmatprep.subr.bf16.mxu0 %v3435_v36  ;;  %v3521_v34 = vld [vmem:[#allocation5 + $0x5cc] ss:$20 sps:$4 sm:$0xff]  }
  0xa6   :  { %1922 = vmatprep.subr.bf16.mxu1 %v3438_v37  ;;  %v3524_v36 = vld [vmem:[#allocation5 + $0x5ac] ss:$20 sps:$4 sm:$0xff]   ;;  %v3519_v37 = vld [vmem:[#allocation5 + $0x5c8] ss:$20 sps:$4 sm:$0xff]  }
  0xa8   :  { %1761 = vmatpush1.bf16.msra.mxu0 %v3433_v38  ;;  %v3522_v38 = vld [vmem:[#allocation5 + $0x5a8] ss:$20 sps:$4 sm:$0xff]  }
  0xa9   :  { %1923 = vmatpush1.bf16.msra.mxu1 %v3436_v39  ;;  %1762 = vmatprep.subr.bf16.mxu0 %v3441_v40  ;;  %v3527_v39 = vld [vmem:[#allocation5 + $0x5f4] ss:$20 sps:$4 sm:$0xff]  }
  0xaa   :  { %1924 = vmatprep.subr.bf16.mxu1 %v3444_v41  ;;  %v3530_v40 = vld [vmem:[#allocation5 + $0x5d4] ss:$20 sps:$4 sm:$0xff]   ;;  %v3525_v41 = vld [vmem:[#allocation5 + $0x5f0] ss:$20 sps:$4 sm:$0xff]  }
  0xac   :  { %1763 = vmatpush1.bf16.msra.mxu0 %v3439_v42  ;;  %v3528_v42 = vld [vmem:[#allocation5 + $0x5d0] ss:$20 sps:$4 sm:$0xff]  }
  0xad   :  { %1925 = vmatpush1.bf16.msra.mxu1 %v3442_v43  ;;  %1764 = vmatprep.subr.bf16.mxu0 %v3447_v44  ;;  %v3533_v43 = vld [vmem:[#allocation5 + $0x61c] ss:$20 sps:$4 sm:$0xff]  }
  0xae   :  { %1926 = vmatprep.subr.bf16.mxu1 %v3450_v45  ;;  %v3536_v44 = vld [vmem:[#allocation5 + $0x5fc] ss:$20 sps:$4 sm:$0xff]   ;;  %v3531_v45 = vld [vmem:[#allocation5 + $0x618] ss:$20 sps:$4 sm:$0xff]  }
  0xb0   :  { %1765 = vmatpush1.bf16.msra.mxu0 %v3445_v46  ;;  %v3534_v46 = vld [vmem:[#allocation5 + $0x5f8] ss:$20 sps:$4 sm:$0xff]  }
  0xb1   :  { %1927 = vmatpush1.bf16.msra.mxu1 %v3448_v47  ;;  %1766 = vmatprep.subr.bf16.mxu0 %v3453_v48  ;;  %v3539_v47 = vld [vmem:[#allocation5 + $0x644] ss:$20 sps:$4 sm:$0xff]  }
  0xb2   :  { %1928 = vmatprep.subr.bf16.mxu1 %v3456_v49  ;;  %v3542_v48 = vld [vmem:[#allocation5 + $0x624] ss:$20 sps:$4 sm:$0xff]   ;;  %v3537_v49 = vld [vmem:[#allocation5 + $0x640] ss:$20 sps:$4 sm:$0xff]  }
  0xb4   :  { %1767 = vmatpush1.bf16.msra.mxu0 %v3451_v50  ;;  %v3540_v50 = vld [vmem:[#allocation5 + $0x620] ss:$20 sps:$4 sm:$0xff]  }
  0xb5   :  { %1929 = vmatpush1.bf16.msra.mxu1 %v3454_v51  ;;  %1768 = vmatprep.subr.bf16.mxu0 %v3459_v53  ;;  %v3545_v51 = vld [vmem:[#allocation5 + $0x66c] ss:$20 sps:$4 sm:$0xff]  }
  0xb6   :  { %1930 = vmatprep.subr.bf16.mxu1 %v3462_v54  ;;  %v3548_v53 = vld [vmem:[#allocation5 + $0x64c] ss:$20 sps:$4 sm:$0xff]   ;;  %v3543_v54 = vld [vmem:[#allocation5 + $0x668] ss:$20 sps:$4 sm:$0xff]  }
  0xb8   :  { %1769 = vmatpush1.bf16.msra.mxu0 %v3457_v55  ;;  %v3546_v55 = vld [vmem:[#allocation5 + $0x648] ss:$20 sps:$4 sm:$0xff]  }
  0xb9   :  { %1931 = vmatpush1.bf16.msra.mxu1 %v3460_v56  ;;  %1770 = vmatprep.subr.bf16.mxu0 %v3465_v57  ;;  %v3551_v56 = vld [vmem:[#allocation5 + $0x694] ss:$20 sps:$4 sm:$0xff]  }
  0xba   :  { %1932 = vmatprep.subr.bf16.mxu1 %v3468_v58  ;;  %v3554_v57 = vld [vmem:[#allocation5 + $0x674] ss:$20 sps:$4 sm:$0xff]   ;;  %v3549_v58 = vld [vmem:[#allocation5 + $0x690] ss:$20 sps:$4 sm:$0xff]  }
  0xbc   :  { %1771 = vmatpush1.bf16.msra.mxu0 %v3463_v59  ;;  %v3552_v59 = vld [vmem:[#allocation5 + $0x670] ss:$20 sps:$4 sm:$0xff]  }
  0xbd   :  { %1933 = vmatpush1.bf16.msra.mxu1 %v3466_v60  ;;  %1772 = vmatprep.subr.bf16.mxu0 %v3471_v61  ;;  %v3557_v60 = vld [vmem:[#allocation5 + $0x6bc] ss:$20 sps:$4 sm:$0xff]  }
  0xbe   :  { %1934 = vmatprep.subr.bf16.mxu1 %v3474_v62  ;;  %v3560_v61 = vld [vmem:[#allocation5 + $0x69c] ss:$20 sps:$4 sm:$0xff]   ;;  %v3555_v62 = vld [vmem:[#allocation5 + $0x6b8] ss:$20 sps:$4 sm:$0xff]  }
  0xc0   :  { %1773 = vmatpush1.bf16.msra.mxu0 %v3469_v63  ;;  %v3558_v63 = vld [vmem:[#allocation5 + $0x698] ss:$20 sps:$4 sm:$0xff]  }
  0xc1   :  { %1935 = vmatpush1.bf16.msra.mxu1 %v3472_v1  ;;  %1774 = vmatprep.subr.bf16.mxu0 %v3477_v2  ;;  %v3563_v1 = vld [vmem:[#allocation5 + $0x6e4] ss:$20 sps:$4 sm:$0xff]  }
  0xc2   :  { %1936 = vmatprep.subr.bf16.mxu1 %v3480_v3  ;;  %v3566_v2 = vld [vmem:[#allocation5 + $0x6c4] ss:$20 sps:$4 sm:$0xff]   ;;  %v3561_v3 = vld [vmem:[#allocation5 + $0x6e0] ss:$20 sps:$4 sm:$0xff]  }
  0xc4   :  { %1775 = vmatpush1.bf16.msra.mxu0 %v3475_v4  ;;  %v3564_v4 = vld [vmem:[#allocation5 + $0x6c0] ss:$20 sps:$4 sm:$0xff]  }
  0xc5   :  { %1937 = vmatpush1.bf16.msra.mxu1 %v3478_v5  ;;  %1776 = vmatprep.subr.bf16.mxu0 %v3483_v6  ;;  %v3569_v5 = vld [vmem:[#allocation5 + $0x70c] ss:$20 sps:$4 sm:$0xff]  }
  0xc6   :  { %1938 = vmatprep.subr.bf16.mxu1 %v3486_v7  ;;  %v3572_v6 = vld [vmem:[#allocation5 + $0x6ec] ss:$20 sps:$4 sm:$0xff]   ;;  %v3567_v7 = vld [vmem:[#allocation5 + $0x708] ss:$20 sps:$4 sm:$0xff]  }
  0xc8   :  { %1777 = vmatpush1.bf16.msra.mxu0 %v3481_v9  ;;  %v3570_v9 = vld [vmem:[#allocation5 + $0x6e8] ss:$20 sps:$4 sm:$0xff]  }
  0xc9   :  { %1939 = vmatpush1.bf16.msra.mxu1 %v3484_v10  ;;  %1787 = vmatprep.subr.bf16.mxu0 %v3491_v11  ;;  %v3575_v10 = vld [vmem:[#allocation5 + $0x734] ss:$20 sps:$4 sm:$0xff]  }
  0xca   :  { %1940 = vmatprep.subr.bf16.mxu1 %v3494_v12  ;;  %v3578_v11 = vld [vmem:[#allocation5 + $0x714] ss:$20 sps:$4 sm:$0xff]   ;;  %v3573_v12 = vld [vmem:[#allocation5 + $0x730] ss:$20 sps:$4 sm:$0xff]  }
  0xcb   :  { %1779 = vmatmul.mubr.bf16.vlgmr.msra.gmra.mrb[0].mxu0 %v3924_v13 }
  0xcc   :  { %1788 = vmatpush1.bf16.msra.mxu0 %v3489_v14  ;;  %1819 = vmatprep.mubr.bf16.mxu0 %v3930_v20  ;;  %v3576_v14 = vld [vmem:[#allocation5 + $0x710] ss:$20 sps:$4 sm:$0xff]  }
  0xcd   :  { %1941 = vmatpush1.bf16.msra.mxu1 %v3492_v15  ;;  %1789 = vmatprep.subr.bf16.mxu0 %v3497_v16  ;;  %v3581_v15 = vld [vmem:[#allocation5 + $0x75c] ss:$20 sps:$4 sm:$0xff]  }
  0xce   :  { %1951 = vmatprep.subr.bf16.mxu1 %v3500_v17  ;;  %v3584_v16 = vld [vmem:[#allocation5 + $0x73c] ss:$20 sps:$4 sm:$0xff]   ;;  %v3579_v17 = vld [vmem:[#allocation5 + $0x758] ss:$20 sps:$4 sm:$0xff]  }
  0xd0   :  { %1943 = vmatmul.mubr.bf16.vlgmr.msra.gmra.mrb[4].mxu1 %v3924_v13  ;;  %1790 = vmatpush1.bf16.msra.mxu0 %v3495_v19  ;;  %v3582_v19 = vld [vmem:[#allocation5 + $0x738] ss:$20 sps:$4 sm:$0xff]  }
  0xd1   :  { %1952 = vmatpush1.bf16.msra.mxu1 %v3498_v21  ;;  %1791 = vmatprep.subr.bf16.mxu0 %v3503_v22  ;;  %v3589_v21 = vld [vmem:[#allocation5 + $0x764] ss:$20 sps:$4 sm:$0xff]  }
  0xd2   :  { %1953 = vmatprep.subr.bf16.mxu1 %v3506_v23  ;;  %1983 = vmatprep.mubr.bf16.mxu1 %v3930_v20  ;;  %v3590_v22 = vld [vmem:[#allocation5 + $0x150] ss:$20 sps:$4 sm:$0xff]   ;;  %v3587_v23 = vld [vmem:[#allocation5 + $0x760] ss:$20 sps:$4 sm:$0xff]  }
  0xd4   :  { %1792 = vmatpush1.bf16.msra.mxu0 %v3501_v24  ;;  %v3938_v24 = vcombine.low %v3926_v18, %v3926_v18  ;;  %v3599_v18 = vld [vmem:[#allocation5 + $0x1c8] ss:$20 sps:$4 sm:$0xff]  }
  0xd5   :  { %1954 = vmatpush1.bf16.msra.mxu1 %v3504_v25  ;;  %1793 = vmatprep.subr.bf16.mxu0 %v3509_v26  ;;  %v3591_v25 = vld [vmem:[#allocation5 + $0x10] ss:$20 sps:$4 sm:$0xff]   ;;  %v3592_v26 = vld [vmem:[#allocation5 + $0x178] ss:$20 sps:$4 sm:$0xff]  }
  0xd6   :  { %1955 = vmatprep.subr.bf16.mxu1 %v3512_v27  ;;  %v3598_v27 = vld [vmem:[#allocation5 + $0x78c] ss:$20 sps:$4 sm:$0xff]  }
  0xd8   :  { %1794 = vmatpush1.bf16.msra.mxu0 %v3507_v28  ;;  %v3593_v28 = vld [vmem:[#allocation5 + $0x38] ss:$20 sps:$4 sm:$0xff]  }
  0xd9   :  { %1956 = vmatpush1.bf16.msra.mxu1 %v3510_v29  ;;  %1795 = vmatprep.subr.bf16.mxu0 %v3515_v30  ;;  %v3594_v29 = vld [vmem:[#allocation5 + $0x1a0] ss:$20 sps:$4 sm:$0xff]   ;;  %v3596_v30 = vld [vmem:[#allocation5 + $0x788] ss:$20 sps:$4 sm:$0xff]  }
  0xda   :  { %1957 = vmatprep.subr.bf16.mxu1 %v3518_v31  ;;  %v3601_v31 = vld [vmem:[#allocation5 + $0x3d0] ss:$20 sps:$4 sm:$0xff]  }
  0xdc   :  { %1796 = vmatpush1.bf16.msra.mxu0 %v3513_v32  ;;  %v3595_v32 = vld [vmem:[#allocation5 + $0x60] ss:$20 sps:$4 sm:$0xff]  }
  0xdd   :  { %1958 = vmatpush1.bf16.msra.mxu1 %v3516_v33  ;;  %1797 = vmatprep.subr.bf16.mxu0 %v3521_v34  ;;  %v3600_v33 = vld [vmem:[#allocation5 + $0x88] ss:$20 sps:$4 sm:$0xff]   ;;  %v3602_v34 = vld [vmem:[#allocation5 + $0x1f0] ss:$20 sps:$4 sm:$0xff]  }
  0xde   :  { %1959 = vmatprep.subr.bf16.mxu1 %v3524_v36  ;;  %v3603_v36 = vld [vmem:[#allocation5 + $0x290] ss:$20 sps:$4 sm:$0xff]  }
  0xe0   :  { %1798 = vmatpush1.bf16.msra.mxu0 %v3519_v37  ;;  %v3604_v37 = vld [vmem:[#allocation5 + $0xb0] ss:$20 sps:$4 sm:$0xff]  }
  0xe1   :  { %1960 = vmatpush1.bf16.msra.mxu1 %v3522_v38  ;;  %1799 = vmatprep.subr.bf16.mxu0 %v3527_v39  ;;  %v3605_v38 = vld [vmem:[#allocation5 + $0x3f8] ss:$20 sps:$4 sm:$0xff]  }
  0xe2   :  { %1961 = vmatprep.subr.bf16.mxu1 %v3530_v40  ;;  %v3606_v39 = vld [vmem:[#allocation5 + $0x218] ss:$20 sps:$4 sm:$0xff]  }
  0xe3   :  { %v3608_v40 = vld [vmem:[#allocation5 + $0xd8] ss:$20 sps:$4 sm:$0xff]  }
  0xe4   :  { %1800 = vmatpush1.bf16.msra.mxu0 %v3525_v41  ;;  %v3944_v41 = vld [vmem:[#allocation2 + $0x18] ss:$0 sps:$4 sm:$0xff]  }
  0xe5   :  { %1962 = vmatpush1.bf16.msra.mxu1 %v3528_v42  ;;  %1801 = vmatprep.subr.bf16.mxu0 %v3533_v43  ;;  %v3609_v42 = vld [vmem:[#allocation5 + $0x420] ss:$20 sps:$4 sm:$0xff]  }
  0xe6   :  { %1963 = vmatprep.subr.bf16.mxu1 %v3536_v44  ;;  %v3611_v43 = vld [vmem:[#allocation5 + $0x2e0] ss:$20 sps:$4 sm:$0xff]  }
  0xe7   :  { %v3612_v44 = vld [vmem:[#allocation5 + $0x100] ss:$20 sps:$4 sm:$0xff]  }
  0xe8   :  { %1802 = vmatpush1.bf16.msra.mxu0 %v3531_v45  ;;  %v3613_v45 = vld [vmem:[#allocation5 + $0x448] ss:$20 sps:$4 sm:$0xff]  }
  0xe9   :  { %1964 = vmatpush1.bf16.msra.mxu1 %v3534_v46  ;;  %1803 = vmatprep.subr.bf16.mxu0 %v3539_v47  ;;  %v3614_v46 = vld [vmem:[#allocation5 + $0x268] ss:$20 sps:$4 sm:$0xff]  }
  0xea   :  { %1965 = vmatprep.subr.bf16.mxu1 %v3542_v48 }
  0xec   :  { %1804 = vmatpush1.bf16.msra.mxu0 %v3537_v49  ;;  %v3615_v49 = vld [vmem:[#allocation5 + $0x308] ss:$20 sps:$4 sm:$0xff]  }
  0xed   :  { %1966 = vmatpush1.bf16.msra.mxu1 %v3540_v50  ;;  %1805 = vmatprep.subr.bf16.mxu0 %v3545_v51  ;;  %v3616_v50 = vld [vmem:[#allocation5 + $0x128] ss:$20 sps:$4 sm:$0xff]  }
  0xee   :  { %1967 = vmatprep.subr.bf16.mxu1 %v3548_v53  ;;  %v3617_v53 = vld [vmem:[#allocation5 + $0x470] ss:$20 sps:$4 sm:$0xff]  }
  0xf0   :  { %1806 = vmatpush1.bf16.msra.mxu0 %v3543_v54  ;;  %v3619_v54 = vld [vmem:[#allocation5 + $0x650] ss:$20 sps:$4 sm:$0xff]  }
  0xf1   :  { %1968 = vmatpush1.bf16.msra.mxu1 %v3546_v55  ;;  %1807 = vmatprep.subr.bf16.mxu0 %v3551_v56  ;;  %v3618_v55 = vld [vmem:[#allocation5 + $0x330] ss:$20 sps:$4 sm:$0xff]  }
  0xf2   :  { %1969 = vmatprep.subr.bf16.mxu1 %v3554_v57  ;;  %v3620_v56 = vld [vmem:[#allocation5 + $0x510] ss:$20 sps:$4 sm:$0xff]   ;;  %v3621_v57 = vld [vmem:[#allocation5 + $0x498] ss:$20 sps:$4 sm:$0xff]  }
  0xf4   :  { %1808 = vmatpush1.bf16.msra.mxu0 %v3549_v58  ;;  %v3623_v58 = vld [vmem:[#allocation5 + $0x678] ss:$20 sps:$4 sm:$0xff]  }
  0xf5   :  { %1970 = vmatpush1.bf16.msra.mxu1 %v3552_v59  ;;  %1809 = vmatprep.subr.bf16.mxu0 %v3557_v60  ;;  %v3622_v59 = vld [vmem:[#allocation5 + $0x358] ss:$20 sps:$4 sm:$0xff]  }
  0xf6   :  { %1971 = vmatprep.subr.bf16.mxu1 %v3560_v61  ;;  %v3624_v60 = vld [vmem:[#allocation5 + $0x538] ss:$20 sps:$4 sm:$0xff]   ;;  %v3625_v61 = vld [vmem:[#allocation5 + $0x4c0] ss:$20 sps:$4 sm:$0xff]  }
  0xf8   :  { %1810 = vmatpush1.bf16.msra.mxu0 %v3555_v62  ;;  %v3627_v62 = vld [vmem:[#allocation5 + $0x6a0] ss:$20 sps:$4 sm:$0xff]  }
  0xf9   :  { %1972 = vmatpush1.bf16.msra.mxu1 %v3558_v63  ;;  %1811 = vmatprep.subr.bf16.mxu0 %v3563_v1  ;;  %v3626_v63 = vld [vmem:[#allocation5 + $0x380] ss:$20 sps:$4 sm:$0xff]  }
  0xfa   :  { %1973 = vmatprep.subr.bf16.mxu1 %v3566_v2  ;;  %v3628_v1 = vld [vmem:[#allocation5 + $0x560] ss:$20 sps:$4 sm:$0xff]   ;;  %v3629_v2 = vld [vmem:[#allocation5 + $0x4e8] ss:$20 sps:$4 sm:$0xff]  }
  0xfc   :  { %1812 = vmatpush1.bf16.msra.mxu0 %v3561_v3  ;;  %v3631_v3 = vld [vmem:[#allocation5 + $0x6c8] ss:$20 sps:$4 sm:$0xff]  }
  0xfd   :  { %1974 = vmatpush1.bf16.msra.mxu1 %v3564_v4  ;;  %1813 = vmatprep.subr.bf16.mxu0 %v3569_v5  ;;  %v3632_v4 = vld [vmem:[#allocation5 + $0x588] ss:$20 sps:$4 sm:$0xff]   ;;  %v3633_v5 = vld [vmem:[#allocation5 + $0x6f0] ss:$20 sps:$4 sm:$0xff]  }
  0xfe   :  { %1975 = vmatprep.subr.bf16.mxu1 %v3572_v6  ;;  %v3634_v6 = vld [vmem:[#allocation5 + $0x5b0] ss:$20 sps:$4 sm:$0xff]  }
 0x100   :  { %1814 = vmatpush1.bf16.msra.mxu0 %v3567_v7  ;;  %v3641_v7 = vld [vmem:[#allocation5 + $0x790] ss:$20 sps:$4 sm:$0xff]  }
 0x101   :  { %1976 = vmatpush1.bf16.msra.mxu1 %v3570_v9  ;;  %1815 = vmatprep.subr.bf16.mxu0 %v3575_v10  ;;  %v3818_v9 = vmov 0.0   ;;  %v3642_v10 = vld [vmem:[#allocation7 + $0x40] sm:$0xff]  }
 0x102   :  { %1977 = vmatprep.subr.bf16.mxu1 %v3578_v11  ;;  %v3636_v11 = vld [vmem:[#allocation5 + $0x5d8] ss:$20 sps:$4 sm:$0xff]  }
 0x104   :  { %1816 = vmatpush1.bf16.msra.mxu0 %v3573_v12  ;;  %v3637_v12 = vld [vmem:[#allocation5 + $0x740] ss:$20 sps:$4 sm:$0xff]  }
 0x105   :  { %1978 = vmatpush1.bf16.msra.mxu1 %v3576_v14  ;;  %1817 = vmatprep.subr.bf16.mxu0 %v3581_v15  ;;  %v3638_v14 = vld [vmem:[#allocation5 + $0x600] ss:$20 sps:$4 sm:$0xff]   ;;  %v3643_v15 = vld [vmem:[#allocation7] sm:$0xff]  }
 0x106   :  { %1979 = vmatprep.subr.bf16.mxu1 %v3584_v16  ;;  %v3639_v16 = vld [vmem:[#allocation5 + $0x768] ss:$20 sps:$4 sm:$0xff]  }
 0x108   :  { %1818 = vmatpush1.bf16.msra.mxu0 %v3579_v17  ;;  %v3644_v17 = vld [vmem:[#allocation7 + $0x48] sm:$0xff]  }
 0x109   :  { %1980 = vmatpush1.bf16.msra.mxu1 %v3582_v19  ;;  %3078 = vmatprep.subr.bf16.mxu0 %v3590_v22  ;;  %v3645_v19 = vld [vmem:[#allocation7 + $0x8] sm:$0xff]   ;;  %v3650_v22 = vld [vmem:[#allocation7 + $0xc0] sm:$0xff]  }
 0x10a   :  { %1981 = vmatprep.subr.bf16.mxu1 %v3589_v21  ;;  %v3646_v21 = vld [vmem:[#allocation7 + $0x50] sm:$0xff]  }
 0x10b   :  { %1820 = vmatmul.mubr.bf16.vlgmr.msra.gmra.mrb[0].mxu0 %v3938_v24 }
 0x10c   :  { %3079 = vmatpush3.bf16.msra.mxu0 %v3591_v25  ;;  %2065 = vmatprep.mubr.bf16.mxu0 %v3906_v52  ;;  %v3607_v52 = vld [vmem:[#allocation5 + $0x2b8] ss:$20 sps:$4 sm:$0xff]  }
 0x10d   :  { %1982 = vmatpush1.bf16.msra.mxu1 %v3587_v23  ;;  %3080 = vmatprep.subr.bf16.mxu0 %v3592_v26  ;;  %v3647_v23 = vld [vmem:[#allocation7 + $0x10] sm:$0xff]   ;;  %v3651_v25 = vld [vmem:[#allocation7 + $0x80] sm:$0xff]   ;;  %v3648_v26 = vld [vmem:[#allocation7 + $0x58] sm:$0xff]  }
 0x10e   :  { %1992 = vmatprep.subr.bf16.mxu1 %v3598_v27  ;;  %v3654_v27 = vld [vmem:[#allocation7 + $0xc8] sm:$0xff]  }
 0x110   :  { %1984 = vmatmul.mubr.bf16.vlgmr.msra.gmra.mrb[4].mxu1 %v3938_v24  ;;  %3081 = vmatpush3.bf16.msra.mxu0 %v3593_v28  ;;  %v3649_v28 = vld [vmem:[#allocation7 + $0x18] sm:$0xff]  }
 0x111   :  { %1993 = vmatpush1.bf16.msra.mxu1 %v3596_v30  ;;  %3082 = vmatprep.subr.bf16.mxu0 %v3594_v29  ;;  %v3655_v29 = vld [vmem:[#allocation7 + $0x88] sm:$0xff]   ;;  %v3652_v30 = vld [vmem:[#allocation7 + $0x60] sm:$0xff]  }
 0x112   :  { %2024 = vmatprep.mubr.bf16.mxu1 %v3817_v0  ;;  %3100 = vmatprep.subr.bf16.mxu1 %v3601_v31  ;;  %v3610_v0 = vld [vmem:[#allocation5 + $0x240] ss:$20 sps:$4 sm:$0xff]   ;;  %v3653_v31 = vld [vmem:[#allocation7 + $0x20] sm:$0xff]  }
 0x114   :  { %3083 = vmatpush3.bf16.msra.mxu0 %v3595_v32  ;;  %v3656_v32 = vld [vmem:[#allocation7 + $0x68] sm:$0xff]  }
 0x115   :  { %3084 = vmatprep.subr.bf16.mxu0 %v3599_v18  ;;  %v3657_v18 = vld [vmem:[#allocation7 + $0x28] sm:$0xff]  }
 0x118   :  { %3085 = vmatpush3.bf16.msra.mxu0 %v3600_v33  ;;  %v3658_v33 = vld [vmem:[#allocation7 + $0xd0] sm:$0xff]  }
 0x119   :  { %3086 = vmatprep.subr.bf16.mxu0 %v3602_v34  ;;  %v3659_v34 = vld [vmem:[#allocation7 + $0x90] sm:$0xff]  }
 0x11c   :  { %3027 = vmatmul.mubr.msk.bf16.vlgmr.msra.gmra.mrb[4].mxu1 %vm1701_vm0, %v3944_v41  ;;  %3087 = vmatpush3.bf16.msra.mxu0 %v3604_v37  ;;  %v3662_v37 = vld [vmem:[#allocation7 + $0xd8] sm:$0xff]  }
 0x11d   :  { %3101 = vmatpush3.bf16.msra.mxu1 %v3603_v36  ;;  %3088 = vmatprep.subr.bf16.mxu0 %v3606_v39  ;;  %v3661_v36 = vld [vmem:[#allocation7 + $0x30] sm:$0xff]   ;;  %v3664_v39 = vld [vmem:[#allocation7 + $0x78] sm:$0xff]  }
 0x11e   :  { %3102 = vmatprep.subr.bf16.mxu1 %v3605_v38  ;;  %2105 = vmatprep.mubr.bf16.mxu1 %v3918_v35  ;;  %v3663_v38 = vld [vmem:[#allocation7 + $0x98] sm:$0xff]  }
 0x120   :  { %3089 = vmatpush3.bf16.msra.mxu0 %v3608_v40  ;;  %v3666_v40 = vld [vmem:[#allocation7 + $0xe0] sm:$0xff]  }
 0x121   :  { %3103 = vmatpush3.bf16.msra.mxu1 %v3607_v52  ;;  %3090 = vmatprep.subr.bf16.mxu0 %v3610_v0  ;;  %v3665_v52 = vld [vmem:[#allocation7 + $0x38] sm:$0xff]   ;;  %v3669_v0 = vld [vmem:[#allocation7 + $0xa8] sm:$0xff]  }
 0x122   :  { %3104 = vmatprep.subr.bf16.mxu1 %v3609_v42  ;;  %v3668_v42 = vld [vmem:[#allocation7 + $0xe8] sm:$0xff]  }
 0x123   :  { %v3949_v47 = vpop.f32.mrb[0].mxu1 }
 0x124   :  { %v3951_v48 = vpop.f32.mrb[1].mxu1  ;;  %3091 = vmatpush3.bf16.msra.mxu0 %v3612_v44  ;;  %v3671_v44 = vld [vmem:[#allocation7 + $0xb0] sm:$0xff]  }
 0x125   :  { %3105 = vmatpush3.bf16.msra.mxu1 %v3611_v43  ;;  %v1866_v51 = vpop.f32.mrb[2].mxu1  ;;  %3092 = vmatprep.subr.bf16.mxu0 %v3614_v46  ;;  %v3670_v43 = vld [vmem:[#allocation7 + $0xf0] sm:$0xff]   ;;  %v3673_v46 = vld [vmem:[#allocation7 + $0xb8] sm:$0xff]  }
 0x126   :  { %3106 = vmatprep.subr.bf16.mxu1 %v3613_v45  ;;  %v1867_v35 = vpop.f32.mrb[3].mxu1  ;;  %v3672_v45 = vld [vmem:[#allocation7 + $0xf8] sm:$0xff]  }
 0x128   :  { %3093 = vmatpush3.bf16.msra.mxu0 %v3616_v50 }
 0x129   :  { %3107 = vmatpush3.bf16.msra.mxu1 %v3615_v49  ;;  %3122 = vmatprep.subr.bf16.mxu0 %v3619_v54  ;;  %v378_v49 = vlaneseq }
 0x12a   :  { %3108 = vmatprep.subr.bf16.mxu1 %v3617_v53  ;;  %v3970_v53 = vld [vmem:[%s4018_s2] sm:$0x1f] }
 0x12b   :  { %2066 = vmatmul.mubr.bf16.vlgmr.msra.gmra.mrb[4].mxu0 %v3910_v8  ;;  %v3630_v8 = vld [vmem:[#allocation5 + $0x3a8] ss:$20 sps:$4 sm:$0xff]   ;;  %v3964_v50 = vshrl.u32 %v378_v49, 7 }
 0x12c   :  { %3123 = vmatpush3.bf16.msra.mxu0 %v3620_v56  ;;  %2145 = vmatprep.mubr.bf16.mxu0 %v3930_v20  ;;  %v3635_v20 = vld [vmem:[#allocation5 + $0x718] ss:$20 sps:$4 sm:$0xff]  }
 0x12d   :  { %3109 = vmatpush3.bf16.msra.mxu1 %v3618_v55  ;;  %3124 = vmatprep.subr.bf16.mxu0 %v3623_v58  ;;  %v380_v51 = vsub.s32 0, %v3964_v50  ;;  %v384_v54 = vsub.s32 1, %v3964_v50 }
 0x12e   :  { %3110 = vmatprep.subr.bf16.mxu1 %v3621_v57 }
 0x12f   :  { %v381_v35 = vrot.slane %v3970_v53, %v380_v51  ;;  %v385_v55 = vrot.slane %v3970_v53, %v384_v54 }
 0x130   :  { %3125 = vmatpush3.bf16.msra.mxu0 %v3624_v60 }
 0x131   :  { %3111 = vmatpush3.bf16.msra.mxu1 %v3622_v59  ;;  %3126 = vmatprep.subr.bf16.mxu0 %v3627_v62 }
 0x132   :  { %3112 = vmatprep.subr.bf16.mxu1 %v3625_v61 }
 0x134   :  { %3127 = vmatpush3.bf16.msra.mxu0 %v3628_v1 }
 0x135   :  { %3113 = vmatpush3.bf16.msra.mxu1 %v3626_v63  ;;  %3128 = vmatprep.subr.bf16.mxu0 %v3631_v3 }
 0x136   :  { %3114 = vmatprep.subr.bf16.mxu1 %v3629_v2 }
 0x138   :  { %3129 = vmatpush3.bf16.msra.mxu0 %v3632_v4 }
 0x139   :  { %3115 = vmatpush3.bf16.msra.mxu1 %v3630_v8  ;;  %3130 = vmatprep.subr.bf16.mxu0 %v3633_v5  ;;  %v3674_v8 = vld [vmem:[#allocation7 + $0x100] sm:$0xff]   ;;  %v388_v5 = vsub.s32 2, %v3964_v50 }
 0x13a   :  { %3208 = vmatprep.subr.bf16.mxu1 %v3818_v9 }
 0x13c   :  { %2106 = vmatmul.mubr.bf16.vlgmr.msra.gmra.mrb[8].mxu1 %v3924_v13  ;;  %3131 = vmatpush3.bf16.msra.mxu0 %v3634_v6  ;;  %v3640_v13 = vld [vmem:[#allocation5 + $0x628] ss:$20 sps:$4 sm:$0xff]   ;;  %v392_v6 = vsub.s32 3, %v3964_v50 }
 0x13d   :  { %3209 = vmatpush3.bf16.msra.mxu1 %v3641_v7  ;;  %3132 = vmatprep.subr.bf16.mxu0 %v3635_v20  ;;  %v3675_v7 = vld [vmem:[#allocation7 + $0x108] sm:$0xff]  }
 0x13e   :  { %3210 = vmatprep.mubr.msk.bf16.mxu1 %vm3819_vm1, %v3818_v9  ;;  %3146 = vmatprep.subr.bf16.mxu1 %v3642_v10  ;;  %v3676_v10 = vld [vmem:[#allocation7 + $0x110] sm:$0xff]  }
 0x140   :  { %3133 = vmatpush3.bf16.msra.mxu0 %v3636_v11 }
 0x141   :  { %3134 = vmatprep.subr.bf16.mxu0 %v3637_v12 }
 0x144   :  { %3211 = vmatmul.mubr.msk.bf16.vlgmr.msra.gmra.mrb[12].mxu1 %vm1701_vm0, %v3944_v41  ;;  %3135 = vmatpush3.bf16.msra.mxu0 %v3638_v14  ;;  %v3667_v41 = vld [vmem:[#allocation7 + $0xa0] sm:$0xff]  }
 0x145   :  { %3147 = vmatpush3.bf16.msra.mxu1 %v3643_v15  ;;  %3136 = vmatprep.subr.bf16.mxu0 %v3639_v16 }
 0x146   :  { %3148 = vmatprep.subr.bf16.mxu1 %v3644_v17 }
 0x148   :  { %3137 = vmatpush3.bf16.msra.mxu0 %v3640_v13 }
 0x149   :  { %3149 = vmatpush3.bf16.msra.mxu1 %v3645_v19  ;;  %3168 = vmatprep.subr.bf16.mxu0 %v3650_v22  ;;  %v3677_v19 = vld [vmem:[#allocation7 + $0x118] sm:$0xff]  }
 0x14a   :  { %3150 = vmatprep.subr.bf16.mxu1 %v3646_v21 }
 0x14b   :  { %2146 = vmatmul.mubr.bf16.vlgmr.msra.gmra.mrb[8].mxu0 %v3938_v24  ;;  %v3660_v24 = vld [vmem:[#allocation7 + $0x70] sm:$0xff]  }
 0x14c   :  { %3169 = vmatpush3.bf16.msra.mxu0 %v3651_v25  ;;  %v3679_v25 = vld [vmem:[#allocation7 + $0x128] sm:$0xff]  }
 0x14d   :  { %3151 = vmatpush3.bf16.msra.mxu1 %v3647_v23  ;;  %3170 = vmatprep.subr.bf16.mxu0 %v3654_v27  ;;  %v3678_v23 = vld [vmem:[#allocation7 + $0x120] sm:$0xff]   ;;  %v3680_v27 = vld [vmem:[#allocation7 + $0x130] sm:$0xff]  }
 0x14e   :  { %3152 = vmatprep.subr.bf16.mxu1 %v3648_v26 }
 0x150   :  { %3171 = vmatpush3.bf16.msra.mxu0 %v3655_v29 }
 0x151   :  { %3153 = vmatpush3.bf16.msra.mxu1 %v3649_v28  ;;  %3172 = vmatprep.subr.bf16.mxu0 %v3658_v33 }
 0x152   :  { %3154 = vmatprep.subr.bf16.mxu1 %v3652_v30 }
 0x154   :  { %3173 = vmatpush3.bf16.msra.mxu0 %v3659_v34 }
 0x155   :  { %3155 = vmatpush3.bf16.msra.mxu1 %v3653_v31  ;;  %3174 = vmatprep.subr.bf16.mxu0 %v3662_v37 }
 0x156   :  { %3156 = vmatprep.subr.bf16.mxu1 %v3656_v32  ;;  %v3681_v32 = vld [vmem:[#allocation7 + $0x138] sm:$0xff]  }
 0x158   :  { %3175 = vmatpush3.bf16.msra.mxu0 %v3663_v38 }
 0x159   :  { %3157 = vmatpush3.bf16.msra.mxu1 %v3657_v18  ;;  %3176 = vmatprep.subr.bf16.mxu0 %v3666_v40  ;;  %v396_v18 = vsub.s32 4, %v3964_v50 }
 0x15a   :  { %3158 = vmatprep.subr.bf16.mxu1 %v3660_v24 }
 0x15b   :  { %v397_v33 = vrot.slane %v3970_v53, %v396_v18 }
 0x15c   :  { %3177 = vmatpush3.bf16.msra.mxu0 %v3667_v41 }
 0x15d   :  { %3159 = vmatpush3.bf16.msra.mxu1 %v3661_v36  ;;  %3178 = vmatprep.subr.bf16.mxu0 %v3668_v42 }
 0x15e   :  { %3160 = vmatprep.subr.bf16.mxu1 %v3664_v39 }
 0x160   :  { %3179 = vmatpush3.bf16.msra.mxu0 %v3669_v0 }
 0x161   :  { %3161 = vmatpush3.bf16.msra.mxu1 %v3665_v52  ;;  %3180 = vmatprep.subr.bf16.mxu0 %v3670_v43 }
 0x162   :  { %3214 = vmatprep.subr.bf16.mxu1 %v3818_v9 }
 0x164   :  { %3181 = vmatpush3.bf16.msra.mxu0 %v3671_v44 }
 0x165   :  { %3182 = vmatprep.subr.bf16.mxu0 %v3672_v45 }
 0x168   :  { %3183 = vmatpush3.bf16.msra.mxu0 %v3673_v46 }
 0x169   :  { %3234 = vmatprep.subr.bf16.mxu0 %v3818_v9 }
 0x1de   :  { %v1821_v56 = vpop.f32.mrb[0].mxu0 }
 0x1df   :  { %v3254_v57 = vadd.f32 %v1821_v56, %v381_v35  ;;  %v1823_v58 = vpop.f32.mrb[1].mxu0  ;;  %v3682_v35 = vld [vmem:[#allocation8] sm:$0xff]   ;;  %v3684_v56 = vld [vmem:[#allocation8 + $0x10] sm:$0xff]  }
 0x1e0   :  { %v3256_v59 = vadd.f32 %v1823_v58, %v385_v55  ;;  %v1825_v60 = vpop.f32.mrb[2].mxu0  ;;  %v3683_v55 = vld [vmem:[#allocation8 + $0x8] sm:$0xff]   ;;  %v3686_v58 = vld [vmem:[#allocation8 + $0x20] sm:$0xff]  }
 0x1e1   :  { %v3255_v61 = vadd.f32 %v3254_v57, %v3949_v47  ;;  %v1826_v62 = vpop.f32.mrb[3].mxu0  ;;  %v389_v47 = vrot.slane %v3970_v53, %v388_v5  ;;  %v3685_v57 = vld [vmem:[#allocation8 + $0x18] sm:$0xff]   ;;  %v3688_v60 = vld [vmem:[#allocation8 + $0x30] sm:$0xff]  }
 0x1e2   :  { %v3257_v63 = vadd.f32 %v3256_v59, %v3951_v48  ;;  %v393_v48 = vrot.slane %v3970_v53, %v392_v6  ;;  %v3687_v59 = vld [vmem:[#allocation8 + $0x28] sm:$0xff]  }
 0x1e3   :  { %v2193_v1 = vmax.f32 %v3255_v61, 0.0  ;;  %v3689_v61 = vld [vmem:[#allocation8 + $0x38] sm:$0xff]  }
 0x1e4   :  { %v2194_v2 = vmax.f32 %v3257_v63, 0.0 }
 0x1e5   :  { %v2198_v4 = vpack.c.bf16 %v2193_v1, %v2193_v1 }
 0x1e6   :  { %v2199_v3 = vpack.c.bf16 %v2194_v2, %v2194_v2 }
 0x1e8   :  { %2555 = vmatprep.mubr.bf16.mxu1 %v2199_v3 }
 0x1e9   :  { %2556 = vmatmul.mubr.bf16.vlgmr.msra.gmra.mrb[16].mxu1 %v2198_v4 }
 0x1ea   :  { %3215 = vmatpush3.bf16.msra.mxu1 %v3674_v8  ;;  %3230 = vmatprep.mubr.msk.bf16.mxu1 %vm3819_vm1, %v3818_v9 }
 0x1eb   :  { %3216 = vmatprep.subr.bf16.mxu1 %v3818_v9 }
 0x1ee   :  { %3217 = vmatpush3.bf16.msra.mxu1 %v3675_v7 }
 0x1ef   :  { %v2026_v20 = vpop.f32.mrb[4].mxu1  ;;  %3218 = vmatprep.subr.bf16.mxu1 %v3818_v9 }
 0x1f0   :  { %v3258_v11 = vadd.f32 %v2026_v20, %v389_v47  ;;  %v2028_v12 = vpop.f32.mrb[5].mxu1 }
 0x1f1   :  { %v3259_v14 = vadd.f32 %v2028_v12, %v393_v48  ;;  %v2030_v15 = vpop.f32.mrb[6].mxu1 }
 0x1f2   :  { %v2195_v16 = vmax.f32 %v3258_v11, 0.0  ;;  %v2031_v17 = vpop.f32.mrb[7].mxu1  ;;  %3219 = vmatpush3.bf16.msra.mxu1 %v3676_v10  ;;  %v3069_v15 = vld [vmem:[%s4021_s5] ss:$0 sm:$0xff] }
 0x1f3   :  { %v2196_v13 = vmax.f32 %v3259_v14, 0.0  ;;  %3220 = vmatprep.subr.bf16.mxu1 %v3818_v9 }
 0x1f4   :  { %v2200_v22 = vpack.c.bf16 %v2195_v16, %v2195_v16 }
 0x1f5   :  { %v2201_v21 = vpack.c.bf16 %v2196_v13, %v2196_v13 }
 0x1f6   :  { %3221 = vmatpush3.bf16.msra.mxu1 %v3677_v19 }
 0x1f7   :  { %2595 = vmatprep.mubr.bf16.mxu0 %v2201_v21  ;;  %3222 = vmatprep.subr.bf16.mxu1 %v3818_v9 }
 0x1f8   :  { %2596 = vmatmul.mubr.bf16.vlgmr.msra.gmra.mrb[12].mxu0 %v2200_v22 }
 0x1f9   :  { %3250 = vmatprep.mubr.msk.bf16.mxu0 %vm3819_vm1, %v3818_v9  ;;  %3235 = vmatpush3.bf16.msra.mxu0 %v3682_v35 }
 0x1fa   :  { %3223 = vmatpush3.bf16.msra.mxu1 %v3678_v23  ;;  %3236 = vmatprep.subr.bf16.mxu0 %v3818_v9 }
 0x1fb   :  { %3224 = vmatprep.subr.bf16.mxu1 %v3818_v9 }
 0x1fd   :  { %3237 = vmatpush3.bf16.msra.mxu0 %v3683_v55 }
 0x1fe   :  { %v3094_v26 = vpop.f32.mrb[4].mxu0  ;;  %3225 = vmatpush3.bf16.msra.mxu1 %v3679_v25  ;;  %3238 = vmatprep.subr.bf16.mxu0 %v3818_v9 }
 0x1ff   :  { %v3095_v28 = vpop.f32.mrb[5].mxu0  ;;  %3226 = vmatprep.subr.bf16.mxu1 %v3818_v9 }
 0x200   :  { %v3096_v29 = vadd.f32 %v3095_v28, %v3094_v26  ;;  %v3097_v30 = vpop.f32.mrb[6].mxu0 }
 0x201   :  { %v3098_v31 = vpop.f32.mrb[7].mxu0  ;;  %3239 = vmatpush3.bf16.msra.mxu0 %v3684_v56 }
 0x202   :  { %3227 = vmatpush3.bf16.msra.mxu1 %v3680_v27  ;;  %v2068_v36 = vadd.f32 %v3096_v29, %v397_v33  ;;  %3240 = vmatprep.subr.bf16.mxu0 %v3818_v9 }
 0x203   :  { %3228 = vmatprep.subr.bf16.mxu1 %v3818_v9 }
 0x205   :  { %3241 = vmatpush3.bf16.msra.mxu0 %v3685_v57 }
 0x206   :  { %3229 = vmatpush3.bf16.msra.mxu1 %v3681_v32  ;;  %3242 = vmatprep.subr.bf16.mxu0 %v3818_v9 }
 0x209   :  { %3243 = vmatpush3.bf16.msra.mxu0 %v3686_v58 }
 0x20a   :  { %3244 = vmatprep.subr.bf16.mxu0 %v3818_v9 }
 0x20d   :  { %3245 = vmatpush3.bf16.msra.mxu0 %v3687_v59 }
 0x20e   :  { %3246 = vmatprep.subr.bf16.mxu0 %v3818_v9 }
 0x20f   :  { %v3116_v34 = vpop.f32.mrb[8].mxu1 }
 0x210   :  { %v3117_v24 = vpop.f32.mrb[9].mxu1 }
 0x211   :  { %v3118_v37 = vadd.f32 %v3117_v24, %v3116_v34  ;;  %v3119_v38 = vpop.f32.mrb[10].mxu1  ;;  %3247 = vmatpush3.bf16.msra.mxu0 %v3688_v60 }
 0x212   :  { %v3120_v39 = vpop.f32.mrb[11].mxu1  ;;  %3248 = vmatprep.subr.bf16.mxu0 %v3818_v9 }
 0x213   :  { %v2108_v52 = vadd.f32 %v3118_v37, %v2068_v36 }
 0x215   :  { %3249 = vmatpush3.bf16.msra.mxu0 %v3689_v61 }
 0x217   :  { %v2187_v40 = vpop.f32.mrb[12].mxu1 }
 0x218   :  { %v3212_v41 = vpop.f32.mrb[13].mxu1 }
 0x219   :  { %v2190_v42 = vpop.f32.mrb[14].mxu1 }
 0x21a   :  { %v3213_v0 = vpop.f32.mrb[15].mxu1 }
 0x21e   :  { %v3138_v43 = vpop.f32.mrb[8].mxu0 }
 0x21f   :  { %v3139_v44 = vpop.f32.mrb[9].mxu0 }
 0x220   :  { %v3140_v45 = vadd.f32 %v3139_v44, %v3138_v43  ;;  %v3141_v46 = vpop.f32.mrb[10].mxu0 }
 0x221   :  { %v3142_v49 = vpop.f32.mrb[11].mxu0 }
 0x222   :  { %v2148_v51 = vadd.f32 %v3140_v45, %v2108_v52 }
 0x224   :  { %v2188_v50 = vadd.f32 %v2187_v40, %v2148_v51 }
 0x226   :  { %v2197_v54 = vmax.f32 %v2188_v50, 0.0 }
 0x228   :  { %v2202_v53 = vpack.c.bf16 %v2197_v54, %v2197_v54 }
 0x22a   :  { %3231 = vmatmul.mubr.bf16.vlgmr.msra.gmra.mrb[20].mxu1 %v2202_v53 }
 0x2bc   :  { %v3162_v62 = vpop.f32.mrb[16].mxu1 }
 0x2bd   :  { %v3163_v63 = vpop.f32.mrb[17].mxu1 }
 0x2be   :  { %v3164_v1 = vadd.f32 %v3163_v63, %v3162_v62  ;;  %v3165_v2 = vpop.f32.mrb[18].mxu1 }
 0x2bf   :  { %v3166_v3 = vpop.f32.mrb[19].mxu1 }
 0x2cb   :  { %v3184_v8 = vpop.f32.mrb[12].mxu0 }
 0x2cc   :  { %v3185_v4 = vpop.f32.mrb[13].mxu0 }
 0x2cd   :  { %v3186_v5 = vadd.f32 %v3185_v4, %v3184_v8  ;;  %v3187_v6 = vpop.f32.mrb[14].mxu0 }
 0x2ce   :  { %v3188_v7 = vpop.f32.mrb[15].mxu0 }
 0x2cf   :  { %v2598_v47 = vadd.f32 %v3186_v5, %v3164_v1 }
 0x2fd   :  { %v2637_v48 = vpop.f32.mrb[20].mxu1 }
 0x2fe   :  { %v2638_v20 = vadd.f32 %v2637_v48, %v2598_v47  ;;  %v3232_v10 = vpop.f32.mrb[21].mxu1 }
 0x2ff   :  { %v2640_v11 = vpop.f32.mrb[22].mxu1 }
 0x300   :  { %v2643_v12 = vmax.f32 %v2638_v20, 0.0  ;;  %v3233_v14 = vpop.f32.mrb[23].mxu1 }
 0x302   :  { %v2644_v9 = vpack.c.bf16 %v2643_v12, %v2643_v12 }
 0x304   :  { %3251 = vmatmul.mubr.bf16.vlgmr.msra.gmra.mrb[16].mxu0 %v2644_v9 }
 0x3d7   :  { %v2750_v16 = vpop.f32.mrb[16].mxu0 }
 0x3d8   :  { %v2751_v17 = vadd.f32 %v3069_v15, %v2750_v16  ;;  %v3252_v13 = vpop.f32.mrb[17].mxu0 }
 0x3d9   :  { %v2753_v19 = vpop.f32.mrb[18].mxu0 }
 0x3da   :  { %2756 = vst [vmem:[#allocation10] sm:$0xff] %v2751_v17  ;;  %v3253_v21 = vpop.f32.mrb[19].mxu0 }
 0x3db   :  { %3790 = shalt.err (!%p3787_p8)
}
 0x3dc   :  { %s3791_s5 = scalar_lea.hbm %s4022_s6, 128 }
 0x3dd   :  { %p3792_p9 = scmp.ne.s32.totalorder %s4022_s6, %s3791_s5  ;;  %p3795_p10 = scmp.lt.u32.totalorder %s3791_s5, %s4022_s6 }
 0x3df   :  { %p3797_p11 = pnand %p3795_p10, %p3792_p9 }
 0x3e1   :  { %3800 = shalt.err (!%p3797_p11)
}
 0x3e2   :  { %2766 = dma.vmem_to_hbm [thread:$0]  %s2764_s24, 128, %s4022_s6, [#allocation4]  }
 0x3e3   :  { %3807 = dma.done.wait [#allocation4], 128  }
 0x3e4   :  { %3808 = vsyncadd [#allocation4], 4294967168 }
 0x3e5   :  { %2770 = vsyncpa [#allocation3], 1 }
 0x3e6   :  { %2771 = vsyncpa [#allocation6], 1 }
 0x3e7   :  { %2772 = vsyncpa [#allocation9], 1 }
 0x3e8   :  { %2773 = vsyncpa [#allocation4], 1 }

</bundles_post_ra>
